<compile_context>
chip_gen: v6e
topology: v6e:2x2x1
jax: 0.10.0
libtpu: 0.0.40
codegen_flags: <defaults>
</compile_context>

<pallas_src>
import functools

import numpy as np

import jax
import jax.numpy as jnp
from jax import lax
from jax.experimental import pallas as pl
from jax.experimental.pallas import tpu as pltpu  # noqa: F401  (TPU backend)

# ----------------------------- model config ----------------------------------
EMBED_DIM = 32
NUM_HEADS = 4
HEAD_DIM = EMBED_DIM // NUM_HEADS
MLP_HIDDEN = 64
NUM_TARGETS = 2
PATCH = 8
IMG = 16
LN_EPS = 1e-5            # PyTorch nn.LayerNorm default eps
NEG_INF = -1e30

C_LANDSAT, C_ET, C_SOIL = 6, 1, 4
T_CLIMATE, F_CLIMATE = 12, 10

N_PATCH = (IMG // PATCH) ** 2                           # 4 tokens per image modality
SEG_COUNTS = (N_PATCH, N_PATCH, T_CLIMATE, N_PATCH)     # per-batch tokens per modality
TOK_PER_BATCH = sum(SEG_COUNTS)                          # 24

# --------------------------- packed-slab layout -------------------------------
F_L = C_LANDSAT * PATCH * PATCH      # 384
F_E = C_ET * PATCH * PATCH           # 64
F_CLIM_PAD = 16                      # climate features padded 10 -> 16
F_S = C_SOIL * PATCH * PATCH         # 256

COL_L = 0
COL_E = COL_L + F_L                  # 384
COL_C = COL_E + F_E                  # 448
COL_S = COL_C + F_CLIM_PAD           # 464
COL_IND = COL_S + F_S                # 720  (4 bias-indicator columns)
EMBED_K = COL_IND + 4                # 724
EMBED_K_PAD = 728                    # rounded to a multiple of 8

ROW_QKV = EMBED_K_PAD                # 728
ROW_O = ROW_QKV + EMBED_DIM          # 760
ROW_M1 = ROW_O + EMBED_DIM           # 792
ROW_M2 = ROW_M1 + EMBED_DIM          # 824
ROW_HEAD = ROW_M2 + MLP_HIDDEN       # 888
W_ROWS = ROW_HEAD + EMBED_DIM        # 920
W_COLS = 3 * EMBED_DIM               # 96

BR_LN1W, BR_LN1B, BR_QKV, BR_O = 0, 1, 2, 3
BR_LN2W, BR_LN2B, BR_M1, BR_M2, BR_HEAD = 4, 5, 6, 7, 8
B_ROWS, B_COLS = 16, 96


# --------------------------- in-kernel helpers --------------------------------
def _bf16(x):
    return x.astype(jnp.bfloat16)


def _mm(a, b):
    """MXU matmul: bf16 operands, f32 accumulation."""
    return jnp.dot(_bf16(a), _bf16(b), preferred_element_type=jnp.float32)


def _layernorm(x, w, b):
    mu = jnp.mean(x, axis=-1, keepdims=True)
    var = jnp.mean(jnp.square(x - mu), axis=-1, keepdims=True)
    return (x - mu) * lax.rsqrt(var + LN_EPS) * w + b


# ------------------------------ fused kernel ----------------------------------
def _fused_forward_kernel(act_ref, w_ref, b_ref, o_ref, *, batch):
    B = batch
    BT = B * TOK_PER_BATCH
    HBT = NUM_HEADS * BT
    D = EMBED_DIM

    # ---- masks generated in-kernel from iota (no mask DMAs) ----
    seg_off, acc = [], 0
    for c in SEG_COUNTS:
        seg_off.append(acc)
        acc += c * B

    def batch_of(tok):
        """Batch-element id of a token index (modality-major token order)."""
        bid = jnp.zeros_like(tok)
        for s, c in enumerate(SEG_COUNTS):
            in_seg = (tok >= seg_off[s]) & (tok < seg_off[s] + c * B)
            local = tok - seg_off[s]
            sbid = jnp.zeros_like(tok)
            for b in range(1, B):                 # compare-sum, no vector int div
                sbid = sbid + (local >= b * c).astype(jnp.int32)
            bid = jnp.where(in_seg, sbid, bid)
        return bid

    def block_of(idx, block):
        h = jnp.zeros_like(idx)
        for i in range(1, NUM_HEADS):
            h = h + (idx >= i * block).astype(jnp.int32)
        return h

    bid_k = batch_of(lax.broadcasted_iota(jnp.int32, (1, BT), 1))     # (1, BT)
    head_lane = block_of(lax.broadcasted_iota(jnp.int32, (1, D), 1), HEAD_DIM)
    row_i = lax.broadcasted_iota(jnp.int32, (HBT, 1), 0)
    head_row = block_of(row_i, BT)                                    # (HBT, 1)
    bid_row = batch_of(row_i - head_row * BT)                         # (HBT, 1)

    # ---- MultiModalEmbed: one block-diagonal matmul (biases via indicator cols)
    x = _mm(act_ref[...], w_ref[0:EMBED_K_PAD, 0:D])                  # (BT, D) f32

    # ---- MMEncoder: pre-LN MHSA, heads stacked along sublanes ----
    xn = _layernorm(x, b_ref[BR_LN1W:BR_LN1W + 1, 0:D],
                    b_ref[BR_LN1B:BR_LN1B + 1, 0:D])
    qkv = _mm(xn, w_ref[ROW_QKV:ROW_QKV + D, 0:3 * D]) \
        + b_ref[BR_QKV:BR_QKV + 1, 0:3 * D]                           # (BT, 3D)
    q = qkv[:, 0:D]                    # 1/sqrt(head_dim) already folded into Wq/bq
    k = qkv[:, D:2 * D]
    v = qkv[:, 2 * D:3 * D]

    # q replicated per head along sublanes, masked to that head's feature block
    q_s = jnp.where(head_row == head_lane,
                    jnp.concatenate([q] * NUM_HEADS, axis=0), 0.0)    # (HBT, D)
    s = lax.dot_general(_bf16(q_s), _bf16(k), (((1,), (1,)), ((), ())),
                        preferred_element_type=jnp.float32)           # (HBT, BT)
    s = jnp.where(bid_row == bid_k, s, NEG_INF)     # forbid cross-batch attention
    m = jnp.max(s, axis=-1, keepdims=True)          # per-(head, query) max
    e = jnp.exp(s - m)
    denom = jnp.sum(e, axis=-1, keepdims=True)      # >= 1, approx recip is safe
    p = e * pl.reciprocal(denom, approx=True)
    ctx_s = _mm(p, v)                                                 # (HBT, D)
    ctx = jnp.zeros((BT, D), jnp.float32)
    for h in range(NUM_HEADS):                      # pick head h's feature block
        ctx = ctx + jnp.where(head_lane == h, ctx_s[h * BT:(h + 1) * BT, :], 0.0)
    x = x + _mm(ctx, w_ref[ROW_O:ROW_O + D, 0:D]) + b_ref[BR_O:BR_O + 1, 0:D]

    # ---- MMEncoder: pre-LN MLP ----
    xn2 = _layernorm(x, b_ref[BR_LN2W:BR_LN2W + 1, 0:D],
                     b_ref[BR_LN2B:BR_LN2B + 1, 0:D])
    # TODO(synk): PyTorch nn.GELU default is exact erf; tanh approximation used.
    h1 = jax.nn.gelu(_mm(xn2, w_ref[ROW_M1:ROW_M1 + D, 0:MLP_HIDDEN])
                     + b_ref[BR_M1:BR_M1 + 1, 0:MLP_HIDDEN])
    x = x + _mm(h1, w_ref[ROW_M2:ROW_M2 + MLP_HIDDEN, 0:D]) \
          + b_ref[BR_M2:BR_M2 + 1, 0:D]

    # ---- MultiRegressionHead: per-batch mean pool (1/n_tok folded into w_head)
    pool = jnp.where(lax.broadcasted_iota(jnp.int32, (B, 1), 0) == bid_k, 1.0, 0.0)
    pooled = _mm(pool, x)                                             # (B, D) sums
    out = _mm(pooled, w_ref[ROW_HEAD:ROW_HEAD + D, 0:D])              # (B, D)
    o_ref[...] = (out[:, 0:NUM_TARGETS]
                  + b_ref[BR_HEAD:BR_HEAD + 1, 0:NUM_TARGETS]).astype(o_ref.dtype)


# ------------------------------- JAX glue -------------------------------------
def extract_patches(x, p):
    """NCHW -> (B*nPatches, C*p*p), matching Conv2d(k=p, s=p) weight layout."""
    B, C, H, W = x.shape
    nh, nw = H // p, W // p
    x = x.reshape(B, C, nh, p, nw, p).transpose(0, 2, 4, 1, 3, 5)
    return x.reshape(B * nh * nw, C * p * p)


def build_act_slab(landsat, et, climate, soil):
    """One block-diagonal bf16 activation slab (B*24, 728): modality features
    placed at their lane offsets + a 1.0 indicator column for the bias row."""
    B = landsat.shape[0]
    lp = extract_patches(landsat, PATCH)                   # (B*4, 384)
    ep = extract_patches(et, PATCH)                        # (B*4, 64)
    cs = climate.reshape(B * T_CLIMATE, F_CLIMATE)         # (B*12, 10)
    sp = extract_patches(soil, PATCH)                      # (B*4, 256)

    def seg(feat, col_off, ind):
        y = jnp.pad(feat, ((0, 0), (col_off, EMBED_K_PAD - col_off - feat.shape[1])))
        return y.at[:, COL_IND + ind].set(1.0)

    act = jnp.concatenate(
        [seg(lp, COL_L, 0), seg(ep, COL_E, 1), seg(cs, COL_C, 2), seg(sp, COL_S, 3)],
        axis=0)
    return act.astype(jnp.bfloat16)                        # (B*24, 728)


def init_params(key):
    ks = jax.random.split(key, 16)
    D, H, T = EMBED_DIM, MLP_HIDDEN, NUM_TARGETS

    def trunc_normal(k, shape, std=0.01):
        return std * jax.random.truncated_normal(k, -2.0, 2.0, shape, jnp.float32)

    def kaiming_conv_flat(k, out_c, in_c, ksz):
        fan_out = out_c * ksz * ksz
        std = (2.0 / fan_out) ** 0.5
        w = std * jax.random.normal(k, (out_c, in_c, ksz, ksz), jnp.float32)
        # (out, in, kh, kw) -> (in*kh*kw, out) to match flattened-patch matmul
        return w.reshape(out_c, in_c * ksz * ksz).T

    zeros = lambda *s: jnp.zeros(s, jnp.float32)
    ones = lambda *s: jnp.ones(s, jnp.float32)

    return {
        # MultiModalEmbed
        "w_landsat": kaiming_conv_flat(ks[0], D, C_LANDSAT, PATCH),
        "b_landsat": zeros(1, D),
        "w_et": kaiming_conv_flat(ks[1], D, C_ET, PATCH),
        "b_et": zeros(1, D),
        "w_soil": kaiming_conv_flat(ks[2], D, C_SOIL, PATCH),
        "b_soil": zeros(1, D),
        "w_climate": trunc_normal(ks[3], (F_CLIMATE, D)),
        "b_climate": zeros(1, D),
        # MMEncoder (one pre-LN transformer block)
        "ln1_w": ones(1, D), "ln1_b": zeros(1, D),
        "w_qkv": trunc_normal(ks[4], (D, 3 * D)), "b_qkv": zeros(1, 3 * D),
        "w_o": trunc_normal(ks[5], (D, D)), "b_o": zeros(1, D),
        "ln2_w": ones(1, D), "ln2_b": zeros(1, D),
        "w_mlp1": trunc_normal(ks[6], (D, H)), "b_mlp1": zeros(1, H),
        "w_mlp2": trunc_normal(ks[7], (H, D)), "b_mlp2": zeros(1, D),
        # MultiRegressionHead
        "w_head": trunc_normal(ks[8], (D, T)), "b_head": zeros(1, T),
    }


def pack_params(params):
    """Pack every weight into one bf16 slab and every bias/LN param into one
    f32 slab (done once, host-side).  Folds the attention scale into Wq/bq and
    the 1/n_tok mean-pool factor into w_head."""
    D = EMBED_DIM
    scale = HEAD_DIM ** -0.5

    w = np.zeros((W_ROWS, W_COLS), np.float32)
    w[COL_L:COL_L + F_L, :D] = np.asarray(params["w_landsat"])
    w[COL_E:COL_E + F_E, :D] = np.asarray(params["w_et"])
    w[COL_C:COL_C + F_CLIMATE, :D] = np.asarray(params["w_climate"])
    w[COL_S:COL_S + F_S, :D] = np.asarray(params["w_soil"])
    w[COL_IND + 0, :D] = np.asarray(params["b_landsat"])[0]
    w[COL_IND + 1, :D] = np.asarray(params["b_et"])[0]
    w[COL_IND + 2, :D] = np.asarray(params["b_climate"])[0]
    w[COL_IND + 3, :D] = np.asarray(params["b_soil"])[0]
    wqkv = np.asarray(params["w_qkv"]).copy()
    wqkv[:, :D] *= scale
    w[ROW_QKV:ROW_QKV + D, :3 * D] = wqkv
    w[ROW_O:ROW_O + D, :D] = np.asarray(params["w_o"])
    w[ROW_M1:ROW_M1 + D, :MLP_HIDDEN] = np.asarray(params["w_mlp1"])
    w[ROW_M2:ROW_M2 + MLP_HIDDEN, :D] = np.asarray(params["w_mlp2"])
    w[ROW_HEAD:ROW_HEAD + D, :NUM_TARGETS] = (
        np.asarray(params["w_head"]) / float(TOK_PER_BATCH))

    b = np.zeros((B_ROWS, B_COLS), np.float32)
    b[BR_LN1W, :D] = np.asarray(params["ln1_w"])[0]
    b[BR_LN1B, :D] = np.asarray(params["ln1_b"])[0]
    bqkv = np.asarray(params["b_qkv"])[0].copy()
    bqkv[:D] *= scale
    b[BR_QKV, :3 * D] = bqkv
    b[BR_O, :D] = np.asarray(params["b_o"])[0]
    b[BR_LN2W, :D] = np.asarray(params["ln2_w"])[0]
    b[BR_LN2B, :D] = np.asarray(params["ln2_b"])[0]
    b[BR_M1, :MLP_HIDDEN] = np.asarray(params["b_mlp1"])[0]
    b[BR_M2, :D] = np.asarray(params["b_mlp2"])[0]
    b[BR_HEAD, :NUM_TARGETS] = np.asarray(params["b_head"])[0]

    return jnp.asarray(w, dtype=jnp.bfloat16), jnp.asarray(b, dtype=jnp.float32)


def yield_benchmark_forward(packed, landsat, et, climate, soil):
    """timeseries=False (single_month) forward — one fused, gridless kernel."""
    wslab, bslab = packed
    B = landsat.shape[0]
    act = build_act_slab(landsat, et, climate, soil)       # (B*24, 728) bf16
    kernel = functools.partial(_fused_forward_kernel, batch=B)
    # Gridless call: whole arrays land in VMEM, single invocation, 3 input DMAs.
    return pl.pallas_call(
        kernel,
        out_shape=jax.ShapeDtypeStruct((B, NUM_TARGETS), jnp.float32),
    )(act, wslab, bslab)


# --------------------------------- main ----------------------------------------
if __name__ == "__main__":
    key = jax.random.PRNGKey(0)
    k_params, k_l, k_e, k_c, k_s = jax.random.split(key, 5)

    params = init_params(k_params)
    packed = pack_params(params)

    B = 2
    landsat = jax.random.normal(k_l, (B, C_LANDSAT, IMG, IMG), jnp.float32)
    et = jax.random.normal(k_e, (B, C_ET, IMG, IMG), jnp.float32)
    climate = jax.random.normal(k_c, (B, T_CLIMATE, F_CLIMATE), jnp.float32)
    soil = jax.random.normal(k_s, (B, C_SOIL, IMG, IMG), jnp.float32)

    fwd = jax.jit(functools.partial(yield_benchmark_forward, packed))
    preds = fwd(landsat, et, climate, soil)
    jax.block_until_ready(preds)

    assert preds.shape == (B, NUM_TARGETS)
    assert bool(jnp.all(jnp.isfinite(preds)))
    print("KERNEL_OK")
</pallas_src>

<mosaic_0001>
module attributes {stable_mosaic.version = 11 : i64} {
  func.func @_fused_forward_kernel(%arg0: memref<48x728xbf16, #tpu.memory_space<vmem>>, %arg1: memref<920x96xbf16, #tpu.memory_space<vmem>>, %arg2: memref<16x96xf32, #tpu.memory_space<vmem>>, %arg3: memref<2x2xf32, #tpu.memory_space<vmem>>) attributes {dimension_semantics = [], scalar_prefetch = 0 : i64, scratch_operands = 0 : i64, tpu.core_type = #tpu.core_type<tc>} {
    %0 = tpu.iota {dimensions = array<i32: 1>} : vector<1x48xi32>
    %c0_i32 = arith.constant 0 : i32
    %1 = vector.broadcast %c0_i32 : i32 to vector<1x48xi32>
    %c0_i32_0 = arith.constant 0 : i32
    %2 = vector.broadcast %c0_i32_0 : i32 to vector<1x48xi32>
    %3 = arith.cmpi sge, %0, %2 : vector<1x48xi32>
    %c8_i32 = arith.constant 8 : i32
    %4 = vector.broadcast %c8_i32 : i32 to vector<1x48xi32>
    %5 = arith.cmpi slt, %0, %4 : vector<1x48xi32>
    %6 = arith.andi %3, %5 : vector<1x48xi1>
    %c0_i32_1 = arith.constant 0 : i32
    %7 = vector.broadcast %c0_i32_1 : i32 to vector<1x48xi32>
    %8 = arith.subi %0, %7 : vector<1x48xi32>
    %c0_i32_2 = arith.constant 0 : i32
    %9 = vector.broadcast %c0_i32_2 : i32 to vector<1x48xi32>
    %c4_i32 = arith.constant 4 : i32
    %10 = vector.broadcast %c4_i32 : i32 to vector<1x48xi32>
    %11 = arith.cmpi sge, %8, %10 : vector<1x48xi32>
    %12 = arith.extui %11 : vector<1x48xi1> to vector<1x48xi32>
    %13 = arith.addi %9, %12 : vector<1x48xi32>
    %14 = arith.select %6, %13, %1 : vector<1x48xi1>, vector<1x48xi32>
    %c8_i32_3 = arith.constant 8 : i32
    %15 = vector.broadcast %c8_i32_3 : i32 to vector<1x48xi32>
    %16 = arith.cmpi sge, %0, %15 : vector<1x48xi32>
    %c16_i32 = arith.constant 16 : i32
    %17 = vector.broadcast %c16_i32 : i32 to vector<1x48xi32>
    %18 = arith.cmpi slt, %0, %17 : vector<1x48xi32>
    %19 = arith.andi %16, %18 : vector<1x48xi1>
    %c8_i32_4 = arith.constant 8 : i32
    %20 = vector.broadcast %c8_i32_4 : i32 to vector<1x48xi32>
    %21 = arith.subi %0, %20 : vector<1x48xi32>
    %c0_i32_5 = arith.constant 0 : i32
    %22 = vector.broadcast %c0_i32_5 : i32 to vector<1x48xi32>
    %c4_i32_6 = arith.constant 4 : i32
    %23 = vector.broadcast %c4_i32_6 : i32 to vector<1x48xi32>
    %24 = arith.cmpi sge, %21, %23 : vector<1x48xi32>
    %25 = arith.extui %24 : vector<1x48xi1> to vector<1x48xi32>
    %26 = arith.addi %22, %25 : vector<1x48xi32>
    %27 = arith.select %19, %26, %14 : vector<1x48xi1>, vector<1x48xi32>
    %c16_i32_7 = arith.constant 16 : i32
    %28 = vector.broadcast %c16_i32_7 : i32 to vector<1x48xi32>
    %29 = arith.cmpi sge, %0, %28 : vector<1x48xi32>
    %c40_i32 = arith.constant 40 : i32
    %30 = vector.broadcast %c40_i32 : i32 to vector<1x48xi32>
    %31 = arith.cmpi slt, %0, %30 : vector<1x48xi32>
    %32 = arith.andi %29, %31 : vector<1x48xi1>
    %c16_i32_8 = arith.constant 16 : i32
    %33 = vector.broadcast %c16_i32_8 : i32 to vector<1x48xi32>
    %34 = arith.subi %0, %33 : vector<1x48xi32>
    %c0_i32_9 = arith.constant 0 : i32
    %35 = vector.broadcast %c0_i32_9 : i32 to vector<1x48xi32>
    %c12_i32 = arith.constant 12 : i32
    %36 = vector.broadcast %c12_i32 : i32 to vector<1x48xi32>
    %37 = arith.cmpi sge, %34, %36 : vector<1x48xi32>
    %38 = arith.extui %37 : vector<1x48xi1> to vector<1x48xi32>
    %39 = arith.addi %35, %38 : vector<1x48xi32>
    %40 = arith.select %32, %39, %27 : vector<1x48xi1>, vector<1x48xi32>
    %c40_i32_10 = arith.constant 40 : i32
    %41 = vector.broadcast %c40_i32_10 : i32 to vector<1x48xi32>
    %42 = arith.cmpi sge, %0, %41 : vector<1x48xi32>
    %c48_i32 = arith.constant 48 : i32
    %43 = vector.broadcast %c48_i32 : i32 to vector<1x48xi32>
    %44 = arith.cmpi slt, %0, %43 : vector<1x48xi32>
    %45 = arith.andi %42, %44 : vector<1x48xi1>
    %c40_i32_11 = arith.constant 40 : i32
    %46 = vector.broadcast %c40_i32_11 : i32 to vector<1x48xi32>
    %47 = arith.subi %0, %46 : vector<1x48xi32>
    %c0_i32_12 = arith.constant 0 : i32
    %48 = vector.broadcast %c0_i32_12 : i32 to vector<1x48xi32>
    %c4_i32_13 = arith.constant 4 : i32
    %49 = vector.broadcast %c4_i32_13 : i32 to vector<1x48xi32>
    %50 = arith.cmpi sge, %47, %49 : vector<1x48xi32>
    %51 = arith.extui %50 : vector<1x48xi1> to vector<1x48xi32>
    %52 = arith.addi %48, %51 : vector<1x48xi32>
    %53 = arith.select %45, %52, %40 : vector<1x48xi1>, vector<1x48xi32>
    %54 = tpu.iota {dimensions = array<i32: 1>} : vector<1x32xi32>
    %c0_i32_14 = arith.constant 0 : i32
    %55 = vector.broadcast %c0_i32_14 : i32 to vector<1x32xi32>
    %c8_i32_15 = arith.constant 8 : i32
    %56 = vector.broadcast %c8_i32_15 : i32 to vector<1x32xi32>
    %57 = arith.cmpi sge, %54, %56 : vector<1x32xi32>
    %58 = arith.extui %57 : vector<1x32xi1> to vector<1x32xi32>
    %59 = arith.addi %55, %58 : vector<1x32xi32>
    %c16_i32_16 = arith.constant 16 : i32
    %60 = vector.broadcast %c16_i32_16 : i32 to vector<1x32xi32>
    %61 = arith.cmpi sge, %54, %60 : vector<1x32xi32>
    %62 = arith.extui %61 : vector<1x32xi1> to vector<1x32xi32>
    %63 = arith.addi %59, %62 : vector<1x32xi32>
    %c24_i32 = arith.constant 24 : i32
    %64 = vector.broadcast %c24_i32 : i32 to vector<1x32xi32>
    %65 = arith.cmpi sge, %54, %64 : vector<1x32xi32>
    %66 = arith.extui %65 : vector<1x32xi1> to vector<1x32xi32>
    %67 = arith.addi %63, %66 : vector<1x32xi32>
    %68 = tpu.iota {dimensions = array<i32: 0>} : vector<192x1xi32>
    %c0_i32_17 = arith.constant 0 : i32
    %69 = vector.broadcast %c0_i32_17 : i32 to vector<192x1xi32>
    %c48_i32_18 = arith.constant 48 : i32
    %70 = vector.broadcast %c48_i32_18 : i32 to vector<192x1xi32>
    %71 = arith.cmpi sge, %68, %70 : vector<192x1xi32>
    %72 = arith.extui %71 : vector<192x1xi1> to vector<192x1xi32>
    %73 = arith.addi %69, %72 : vector<192x1xi32>
    %c96_i32 = arith.constant 96 : i32
    %74 = vector.broadcast %c96_i32 : i32 to vector<192x1xi32>
    %75 = arith.cmpi sge, %68, %74 : vector<192x1xi32>
    %76 = arith.extui %75 : vector<192x1xi1> to vector<192x1xi32>
    %77 = arith.addi %73, %76 : vector<192x1xi32>
    %c144_i32 = arith.constant 144 : i32
    %78 = vector.broadcast %c144_i32 : i32 to vector<192x1xi32>
    %79 = arith.cmpi sge, %68, %78 : vector<192x1xi32>
    %80 = arith.extui %79 : vector<192x1xi1> to vector<192x1xi32>
    %81 = arith.addi %77, %80 : vector<192x1xi32>
    %c48_i32_19 = arith.constant 48 : i32
    %82 = vector.broadcast %c48_i32_19 : i32 to vector<192x1xi32>
    %83 = arith.muli %81, %82 : vector<192x1xi32>
    %84 = arith.subi %68, %83 : vector<192x1xi32>
    %c0_i32_20 = arith.constant 0 : i32
    %85 = vector.broadcast %c0_i32_20 : i32 to vector<192x1xi32>
    %c0_i32_21 = arith.constant 0 : i32
    %86 = vector.broadcast %c0_i32_21 : i32 to vector<192x1xi32>
    %87 = arith.cmpi sge, %84, %86 : vector<192x1xi32>
    %c8_i32_22 = arith.constant 8 : i32
    %88 = vector.broadcast %c8_i32_22 : i32 to vector<192x1xi32>
    %89 = arith.cmpi slt, %84, %88 : vector<192x1xi32>
    %90 = arith.andi %87, %89 : vector<192x1xi1>
    %c0_i32_23 = arith.constant 0 : i32
    %91 = vector.broadcast %c0_i32_23 : i32 to vector<192x1xi32>
    %92 = arith.subi %84, %91 : vector<192x1xi32>
    %c0_i32_24 = arith.constant 0 : i32
    %93 = vector.broadcast %c0_i32_24 : i32 to vector<192x1xi32>
    %c4_i32_25 = arith.constant 4 : i32
    %94 = vector.broadcast %c4_i32_25 : i32 to vector<192x1xi32>
    %95 = arith.cmpi sge, %92, %94 : vector<192x1xi32>
    %96 = arith.extui %95 : vector<192x1xi1> to vector<192x1xi32>
    %97 = arith.addi %93, %96 : vector<192x1xi32>
    %98 = arith.select %90, %97, %85 : vector<192x1xi1>, vector<192x1xi32>
    %c8_i32_26 = arith.constant 8 : i32
    %99 = vector.broadcast %c8_i32_26 : i32 to vector<192x1xi32>
    %100 = arith.cmpi sge, %84, %99 : vector<192x1xi32>
    %c16_i32_27 = arith.constant 16 : i32
    %101 = vector.broadcast %c16_i32_27 : i32 to vector<192x1xi32>
    %102 = arith.cmpi slt, %84, %101 : vector<192x1xi32>
    %103 = arith.andi %100, %102 : vector<192x1xi1>
    %c8_i32_28 = arith.constant 8 : i32
    %104 = vector.broadcast %c8_i32_28 : i32 to vector<192x1xi32>
    %105 = arith.subi %84, %104 : vector<192x1xi32>
    %c0_i32_29 = arith.constant 0 : i32
    %106 = vector.broadcast %c0_i32_29 : i32 to vector<192x1xi32>
    %c4_i32_30 = arith.constant 4 : i32
    %107 = vector.broadcast %c4_i32_30 : i32 to vector<192x1xi32>
    %108 = arith.cmpi sge, %105, %107 : vector<192x1xi32>
    %109 = arith.extui %108 : vector<192x1xi1> to vector<192x1xi32>
    %110 = arith.addi %106, %109 : vector<192x1xi32>
    %111 = arith.select %103, %110, %98 : vector<192x1xi1>, vector<192x1xi32>
    %c16_i32_31 = arith.constant 16 : i32
    %112 = vector.broadcast %c16_i32_31 : i32 to vector<192x1xi32>
    %113 = arith.cmpi sge, %84, %112 : vector<192x1xi32>
    %c40_i32_32 = arith.constant 40 : i32
    %114 = vector.broadcast %c40_i32_32 : i32 to vector<192x1xi32>
    %115 = arith.cmpi slt, %84, %114 : vector<192x1xi32>
    %116 = arith.andi %113, %115 : vector<192x1xi1>
    %c16_i32_33 = arith.constant 16 : i32
    %117 = vector.broadcast %c16_i32_33 : i32 to vector<192x1xi32>
    %118 = arith.subi %84, %117 : vector<192x1xi32>
    %c0_i32_34 = arith.constant 0 : i32
    %119 = vector.broadcast %c0_i32_34 : i32 to vector<192x1xi32>
    %c12_i32_35 = arith.constant 12 : i32
    %120 = vector.broadcast %c12_i32_35 : i32 to vector<192x1xi32>
    %121 = arith.cmpi sge, %118, %120 : vector<192x1xi32>
    %122 = arith.extui %121 : vector<192x1xi1> to vector<192x1xi32>
    %123 = arith.addi %119, %122 : vector<192x1xi32>
    %124 = arith.select %116, %123, %111 : vector<192x1xi1>, vector<192x1xi32>
    %c40_i32_36 = arith.constant 40 : i32
    %125 = vector.broadcast %c40_i32_36 : i32 to vector<192x1xi32>
    %126 = arith.cmpi sge, %84, %125 : vector<192x1xi32>
    %c48_i32_37 = arith.constant 48 : i32
    %127 = vector.broadcast %c48_i32_37 : i32 to vector<192x1xi32>
    %128 = arith.cmpi slt, %84, %127 : vector<192x1xi32>
    %129 = arith.andi %126, %128 : vector<192x1xi1>
    %c40_i32_38 = arith.constant 40 : i32
    %130 = vector.broadcast %c40_i32_38 : i32 to vector<192x1xi32>
    %131 = arith.subi %84, %130 : vector<192x1xi32>
    %c0_i32_39 = arith.constant 0 : i32
    %132 = vector.broadcast %c0_i32_39 : i32 to vector<192x1xi32>
    %c4_i32_40 = arith.constant 4 : i32
    %133 = vector.broadcast %c4_i32_40 : i32 to vector<192x1xi32>
    %134 = arith.cmpi sge, %131, %133 : vector<192x1xi32>
    %135 = arith.extui %134 : vector<192x1xi1> to vector<192x1xi32>
    %136 = arith.addi %132, %135 : vector<192x1xi32>
    %137 = arith.select %129, %136, %124 : vector<192x1xi1>, vector<192x1xi32>
    %c0 = arith.constant 0 : index
    %c0_41 = arith.constant 0 : index
    %138 = vector.load %arg0[%c0, %c0_41] : memref<48x728xbf16, #tpu.memory_space<vmem>>, vector<48x728xbf16>
    %c0_42 = arith.constant 0 : index
    %c0_43 = arith.constant 0 : index
    %139 = vector.load %arg1[%c0_42, %c0_43] : memref<920x96xbf16, #tpu.memory_space<vmem>>, vector<728x32xbf16>
    %cst = arith.constant dense<0.000000e+00> : vector<48x32xf32>
    %140 = tpu.matmul %138, %139, %cst {dimension_numbers = #tpu.dot_dimension_numbers<[1], [0], [0], [1], [0, 0, 1, 1], [], []>} : vector<48x728xbf16>, vector<728x32xbf16>, vector<48x32xf32> -> vector<48x32xf32>
    %c0_44 = arith.constant 0 : index
    %c0_45 = arith.constant 0 : index
    %141 = vector.load %arg2[%c0_44, %c0_45] : memref<16x96xf32, #tpu.memory_space<vmem>>, vector<1x32xf32>
    %c1 = arith.constant 1 : index
    %c0_46 = arith.constant 0 : index
    %142 = vector.load %arg2[%c1, %c0_46] : memref<16x96xf32, #tpu.memory_space<vmem>>, vector<1x32xf32>
    %cst_47 = arith.constant dense<0.000000e+00> : vector<48xf32>
    %143 = vector.multi_reduction <add>, %140, %cst_47 [1] : vector<48x32xf32> to vector<48xf32>
    %144 = vector.shape_cast %143 : vector<48xf32> to vector<48x1xf32>
    %cst_48 = arith.constant 3.200000e+01 : f32
    %145 = vector.broadcast %cst_48 : f32 to vector<48x1xf32>
    %146 = arith.divf %144, %145 : vector<48x1xf32>
    %147 = vector.broadcast %146 : vector<48x1xf32> to vector<48x32xf32>
    %148 = arith.subf %140, %147 : vector<48x32xf32>
    %149 = arith.mulf %148, %148 : vector<48x32xf32>
    %cst_49 = arith.constant dense<0.000000e+00> : vector<48xf32>
    %150 = vector.multi_reduction <add>, %149, %cst_49 [1] : vector<48x32xf32> to vector<48xf32>
    %151 = vector.shape_cast %150 : vector<48xf32> to vector<48x1xf32>
    %cst_50 = arith.constant 3.200000e+01 : f32
    %152 = vector.broadcast %cst_50 : f32 to vector<48x1xf32>
    %153 = arith.divf %151, %152 : vector<48x1xf32>
    %154 = vector.broadcast %146 : vector<48x1xf32> to vector<48x32xf32>
    %155 = arith.subf %140, %154 : vector<48x32xf32>
    %cst_51 = arith.constant 9.99999974E-6 : f32
    %156 = vector.broadcast %cst_51 : f32 to vector<48x1xf32>
    %157 = arith.addf %153, %156 : vector<48x1xf32>
    %158 = math.rsqrt %157 : vector<48x1xf32>
    %159 = vector.broadcast %158 : vector<48x1xf32> to vector<48x32xf32>
    %160 = arith.mulf %155, %159 : vector<48x32xf32>
    %161 = vector.broadcast %141 : vector<1x32xf32> to vector<48x32xf32>
    %162 = arith.mulf %160, %161 : vector<48x32xf32>
    %163 = vector.broadcast %142 : vector<1x32xf32> to vector<48x32xf32>
    %164 = arith.addf %162, %163 : vector<48x32xf32>
    %c728 = arith.constant 728 : index
    %c0_52 = arith.constant 0 : index
    %165 = vector.load %arg1[%c728, %c0_52] : memref<920x96xbf16, #tpu.memory_space<vmem>>, vector<32x96xbf16>
    %166 = arith.truncf %164 : vector<48x32xf32> to vector<48x32xbf16>
    %cst_53 = arith.constant dense<0.000000e+00> : vector<48x96xf32>
    %167 = tpu.matmul %166, %165, %cst_53 {dimension_numbers = #tpu.dot_dimension_numbers<[1], [0], [0], [1], [0, 0, 1, 1], [], []>} : vector<48x32xbf16>, vector<32x96xbf16>, vector<48x96xf32> -> vector<48x96xf32>
    %c2 = arith.constant 2 : index
    %c0_54 = arith.constant 0 : index
    %168 = vector.load %arg2[%c2, %c0_54] : memref<16x96xf32, #tpu.memory_space<vmem>>, vector<1x96xf32>
    %169 = vector.broadcast %168 : vector<1x96xf32> to vector<48x96xf32>
    %170 = arith.addf %167, %169 : vector<48x96xf32>
    %171 = vector.extract_strided_slice %170 {offsets = [0, 0], sizes = [48, 32], strides = [1, 1]} : vector<48x96xf32> to vector<48x32xf32>
    %172 = vector.extract_strided_slice %170 {offsets = [0, 32], sizes = [48, 32], strides = [1, 1]} : vector<48x96xf32> to vector<48x32xf32>
    %173 = vector.extract_strided_slice %170 {offsets = [0, 64], sizes = [48, 32], strides = [1, 1]} : vector<48x96xf32> to vector<48x32xf32>
    %174 = vector.broadcast %81 : vector<192x1xi32> to vector<192x32xi32>
    %175 = vector.broadcast %67 : vector<1x32xi32> to vector<192x32xi32>
    %176 = arith.cmpi eq, %174, %175 : vector<192x32xi32>
    %177 = tpu.concatenate %171, %171, %171, %171 in 0 : vector<48x32xf32>, vector<48x32xf32>, vector<48x32xf32>, vector<48x32xf32> -> vector<192x32xf32>
    %cst_55 = arith.constant 0.000000e+00 : f32
    %178 = vector.broadcast %cst_55 : f32 to vector<192x32xf32>
    %179 = arith.select %176, %177, %178 : vector<192x32xi1>, vector<192x32xf32>
    %180 = arith.truncf %179 : vector<192x32xf32> to vector<192x32xbf16>
    %181 = arith.truncf %172 : vector<48x32xf32> to vector<48x32xbf16>
    %cst_56 = arith.constant dense<0.000000e+00> : vector<192x48xf32>
    %182 = tpu.matmul %180, %181, %cst_56 {dimension_numbers = #tpu.dot_dimension_numbers<[1], [1], [0], [0], [0, 0, 1, 0], [], []>} : vector<192x32xbf16>, vector<48x32xbf16>, vector<192x48xf32> -> vector<192x48xf32>
    %183 = vector.broadcast %137 : vector<192x1xi32> to vector<192x48xi32>
    %184 = vector.broadcast %53 : vector<1x48xi32> to vector<192x48xi32>
    %185 = arith.cmpi eq, %183, %184 : vector<192x48xi32>
    %cst_57 = arith.constant -1.000000e+30 : f32
    %186 = vector.broadcast %cst_57 : f32 to vector<192x48xf32>
    %187 = arith.select %185, %182, %186 : vector<192x48xi1>, vector<192x48xf32>
    %cst_58 = arith.constant dense<0xFF800000> : vector<192xf32>
    %188 = vector.multi_reduction <maximumf>, %187, %cst_58 [1] : vector<192x48xf32> to vector<192xf32>
    %189 = vector.shape_cast %188 : vector<192xf32> to vector<192x1xf32>
    %190 = vector.broadcast %189 : vector<192x1xf32> to vector<192x48xf32>
    %191 = arith.subf %187, %190 : vector<192x48xf32>
    %192 = math.exp %191 : vector<192x48xf32>
    %cst_59 = arith.constant dense<0.000000e+00> : vector<192xf32>
    %193 = vector.multi_reduction <add>, %192, %cst_59 [1] : vector<192x48xf32> to vector<192xf32>
    %194 = vector.shape_cast %193 : vector<192xf32> to vector<192x1xf32>
    %195 = tpu.reciprocal %194 {approx = true} : vector<192x1xf32> -> vector<192x1xf32>
    %196 = vector.broadcast %195 : vector<192x1xf32> to vector<192x48xf32>
    %197 = arith.mulf %192, %196 : vector<192x48xf32>
    %198 = arith.truncf %197 : vector<192x48xf32> to vector<192x48xbf16>
    %199 = arith.truncf %173 : vector<48x32xf32> to vector<48x32xbf16>
    %cst_60 = arith.constant dense<0.000000e+00> : vector<192x32xf32>
    %200 = tpu.matmul %198, %199, %cst_60 {dimension_numbers = #tpu.dot_dimension_numbers<[1], [0], [0], [1], [0, 0, 1, 1], [], []>} : vector<192x48xbf16>, vector<48x32xbf16>, vector<192x32xf32> -> vector<192x32xf32>
    %cst_61 = arith.constant 0.000000e+00 : f32
    %201 = vector.broadcast %cst_61 : f32 to vector<48x32xf32>
    %c0_i32_62 = arith.constant 0 : i32
    %202 = vector.broadcast %c0_i32_62 : i32 to vector<1x32xi32>
    %203 = arith.cmpi eq, %67, %202 : vector<1x32xi32>
    %204 = vector.extract_strided_slice %200 {offsets = [0, 0], sizes = [48, 32], strides = [1, 1]} : vector<192x32xf32> to vector<48x32xf32>
    %cst_63 = arith.constant 0.000000e+00 : f32
    %205 = vector.shape_cast %203 : vector<1x32xi1> to vector<1x32xi1>
    %206 = vector.broadcast %205 : vector<1x32xi1> to vector<48x32xi1>
    %207 = vector.broadcast %cst_63 : f32 to vector<48x32xf32>
    %208 = arith.select %206, %204, %207 : vector<48x32xi1>, vector<48x32xf32>
    %209 = arith.addf %201, %208 : vector<48x32xf32>
    %c1_i32 = arith.constant 1 : i32
    %210 = vector.broadcast %c1_i32 : i32 to vector<1x32xi32>
    %211 = arith.cmpi eq, %67, %210 : vector<1x32xi32>
    %212 = vector.extract_strided_slice %200 {offsets = [48, 0], sizes = [48, 32], strides = [1, 1]} : vector<192x32xf32> to vector<48x32xf32>
    %cst_64 = arith.constant 0.000000e+00 : f32
    %213 = vector.shape_cast %211 : vector<1x32xi1> to vector<1x32xi1>
    %214 = vector.broadcast %213 : vector<1x32xi1> to vector<48x32xi1>
    %215 = vector.broadcast %cst_64 : f32 to vector<48x32xf32>
    %216 = arith.select %214, %212, %215 : vector<48x32xi1>, vector<48x32xf32>
    %217 = arith.addf %209, %216 : vector<48x32xf32>
    %c2_i32 = arith.constant 2 : i32
    %218 = vector.broadcast %c2_i32 : i32 to vector<1x32xi32>
    %219 = arith.cmpi eq, %67, %218 : vector<1x32xi32>
    %220 = vector.extract_strided_slice %200 {offsets = [96, 0], sizes = [48, 32], strides = [1, 1]} : vector<192x32xf32> to vector<48x32xf32>
    %cst_65 = arith.constant 0.000000e+00 : f32
    %221 = vector.shape_cast %219 : vector<1x32xi1> to vector<1x32xi1>
    %222 = vector.broadcast %221 : vector<1x32xi1> to vector<48x32xi1>
    %223 = vector.broadcast %cst_65 : f32 to vector<48x32xf32>
    %224 = arith.select %222, %220, %223 : vector<48x32xi1>, vector<48x32xf32>
    %225 = arith.addf %217, %224 : vector<48x32xf32>
    %c3_i32 = arith.constant 3 : i32
    %226 = vector.broadcast %c3_i32 : i32 to vector<1x32xi32>
    %227 = arith.cmpi eq, %67, %226 : vector<1x32xi32>
    %228 = vector.extract_strided_slice %200 {offsets = [144, 0], sizes = [48, 32], strides = [1, 1]} : vector<192x32xf32> to vector<48x32xf32>
    %cst_66 = arith.constant 0.000000e+00 : f32
    %229 = vector.shape_cast %227 : vector<1x32xi1> to vector<1x32xi1>
    %230 = vector.broadcast %229 : vector<1x32xi1> to vector<48x32xi1>
    %231 = vector.broadcast %cst_66 : f32 to vector<48x32xf32>
    %232 = arith.select %230, %228, %231 : vector<48x32xi1>, vector<48x32xf32>
    %233 = arith.addf %225, %232 : vector<48x32xf32>
    %c760 = arith.constant 760 : index
    %c0_67 = arith.constant 0 : index
    %234 = vector.load %arg1[%c760, %c0_67] : memref<920x96xbf16, #tpu.memory_space<vmem>>, vector<32x32xbf16>
    %235 = arith.truncf %233 : vector<48x32xf32> to vector<48x32xbf16>
    %cst_68 = arith.constant dense<0.000000e+00> : vector<48x32xf32>
    %236 = tpu.matmul %235, %234, %cst_68 {dimension_numbers = #tpu.dot_dimension_numbers<[1], [0], [0], [1], [0, 0, 1, 1], [], []>} : vector<48x32xbf16>, vector<32x32xbf16>, vector<48x32xf32> -> vector<48x32xf32>
    %237 = arith.addf %140, %236 : vector<48x32xf32>
    %c3 = arith.constant 3 : index
    %c0_69 = arith.constant 0 : index
    %238 = vector.load %arg2[%c3, %c0_69] : memref<16x96xf32, #tpu.memory_space<vmem>>, vector<1x32xf32>
    %239 = vector.broadcast %238 : vector<1x32xf32> to vector<48x32xf32>
    %240 = arith.addf %237, %239 : vector<48x32xf32>
    %c4 = arith.constant 4 : index
    %c0_70 = arith.constant 0 : index
    %241 = vector.load %arg2[%c4, %c0_70] : memref<16x96xf32, #tpu.memory_space<vmem>>, vector<1x32xf32>
    %c5 = arith.constant 5 : index
    %c0_71 = arith.constant 0 : index
    %242 = vector.load %arg2[%c5, %c0_71] : memref<16x96xf32, #tpu.memory_space<vmem>>, vector<1x32xf32>
    %cst_72 = arith.constant dense<0.000000e+00> : vector<48xf32>
    %243 = vector.multi_reduction <add>, %240, %cst_72 [1] : vector<48x32xf32> to vector<48xf32>
    %244 = vector.shape_cast %243 : vector<48xf32> to vector<48x1xf32>
    %cst_73 = arith.constant 3.200000e+01 : f32
    %245 = vector.broadcast %cst_73 : f32 to vector<48x1xf32>
    %246 = arith.divf %244, %245 : vector<48x1xf32>
    %247 = vector.broadcast %246 : vector<48x1xf32> to vector<48x32xf32>
    %248 = arith.subf %240, %247 : vector<48x32xf32>
    %249 = arith.mulf %248, %248 : vector<48x32xf32>
    %cst_74 = arith.constant dense<0.000000e+00> : vector<48xf32>
    %250 = vector.multi_reduction <add>, %249, %cst_74 [1] : vector<48x32xf32> to vector<48xf32>
    %251 = vector.shape_cast %250 : vector<48xf32> to vector<48x1xf32>
    %cst_75 = arith.constant 3.200000e+01 : f32
    %252 = vector.broadcast %cst_75 : f32 to vector<48x1xf32>
    %253 = arith.divf %251, %252 : vector<48x1xf32>
    %254 = vector.broadcast %246 : vector<48x1xf32> to vector<48x32xf32>
    %255 = arith.subf %240, %254 : vector<48x32xf32>
    %cst_76 = arith.constant 9.99999974E-6 : f32
    %256 = vector.broadcast %cst_76 : f32 to vector<48x1xf32>
    %257 = arith.addf %253, %256 : vector<48x1xf32>
    %258 = math.rsqrt %257 : vector<48x1xf32>
    %259 = vector.broadcast %258 : vector<48x1xf32> to vector<48x32xf32>
    %260 = arith.mulf %255, %259 : vector<48x32xf32>
    %261 = vector.broadcast %241 : vector<1x32xf32> to vector<48x32xf32>
    %262 = arith.mulf %260, %261 : vector<48x32xf32>
    %263 = vector.broadcast %242 : vector<1x32xf32> to vector<48x32xf32>
    %264 = arith.addf %262, %263 : vector<48x32xf32>
    %c792 = arith.constant 792 : index
    %c0_77 = arith.constant 0 : index
    %265 = vector.load %arg1[%c792, %c0_77] : memref<920x96xbf16, #tpu.memory_space<vmem>>, vector<32x64xbf16>
    %266 = arith.truncf %264 : vector<48x32xf32> to vector<48x32xbf16>
    %cst_78 = arith.constant dense<0.000000e+00> : vector<48x64xf32>
    %267 = tpu.matmul %266, %265, %cst_78 {dimension_numbers = #tpu.dot_dimension_numbers<[1], [0], [0], [1], [0, 0, 1, 1], [], []>} : vector<48x32xbf16>, vector<32x64xbf16>, vector<48x64xf32> -> vector<48x64xf32>
    %c6 = arith.constant 6 : index
    %c0_79 = arith.constant 0 : index
    %268 = vector.load %arg2[%c6, %c0_79] : memref<16x96xf32, #tpu.memory_space<vmem>>, vector<1x64xf32>
    %269 = vector.broadcast %268 : vector<1x64xf32> to vector<48x64xf32>
    %270 = arith.addf %267, %269 : vector<48x64xf32>
    %271 = arith.mulf %270, %270 : vector<48x64xf32>
    %272 = arith.mulf %270, %271 : vector<48x64xf32>
    %cst_80 = arith.constant 4.471500e-02 : f32
    %273 = vector.broadcast %cst_80 : f32 to vector<48x64xf32>
    %274 = arith.mulf %273, %272 : vector<48x64xf32>
    %275 = arith.addf %270, %274 : vector<48x64xf32>
    %cst_81 = arith.constant 0.797884583 : f32
    %276 = vector.broadcast %cst_81 : f32 to vector<48x64xf32>
    %277 = arith.mulf %276, %275 : vector<48x64xf32>
    %278 = math.tanh %277 : vector<48x64xf32>
    %cst_82 = arith.constant 1.000000e+00 : f32
    %279 = vector.broadcast %cst_82 : f32 to vector<48x64xf32>
    %280 = arith.addf %279, %278 : vector<48x64xf32>
    %cst_83 = arith.constant 5.000000e-01 : f32
    %281 = vector.broadcast %cst_83 : f32 to vector<48x64xf32>
    %282 = arith.mulf %281, %280 : vector<48x64xf32>
    %283 = arith.mulf %270, %282 : vector<48x64xf32>
    %c824 = arith.constant 824 : index
    %c0_84 = arith.constant 0 : index
    %284 = vector.load %arg1[%c824, %c0_84] : memref<920x96xbf16, #tpu.memory_space<vmem>>, vector<64x32xbf16>
    %285 = arith.truncf %283 : vector<48x64xf32> to vector<48x64xbf16>
    %cst_85 = arith.constant dense<0.000000e+00> : vector<48x32xf32>
    %286 = tpu.matmul %285, %284, %cst_85 {dimension_numbers = #tpu.dot_dimension_numbers<[1], [0], [0], [1], [0, 0, 1, 1], [], []>} : vector<48x64xbf16>, vector<64x32xbf16>, vector<48x32xf32> -> vector<48x32xf32>
    %287 = arith.addf %240, %286 : vector<48x32xf32>
    %c7 = arith.constant 7 : index
    %c0_86 = arith.constant 0 : index
    %288 = vector.load %arg2[%c7, %c0_86] : memref<16x96xf32, #tpu.memory_space<vmem>>, vector<1x32xf32>
    %289 = vector.broadcast %288 : vector<1x32xf32> to vector<48x32xf32>
    %290 = arith.addf %287, %289 : vector<48x32xf32>
    %291 = tpu.iota {dimensions = array<i32: 0>} : vector<2x1xi32>
    %292 = vector.broadcast %291 : vector<2x1xi32> to vector<2x48xi32>
    %293 = vector.broadcast %53 : vector<1x48xi32> to vector<2x48xi32>
    %294 = arith.cmpi eq, %292, %293 : vector<2x48xi32>
    %cst_87 = arith.constant 1.000000e+00 : f32
    %cst_88 = arith.constant 0.000000e+00 : f32
    %295 = vector.broadcast %cst_87 : f32 to vector<2x48xf32>
    %296 = vector.broadcast %cst_88 : f32 to vector<2x48xf32>
    %297 = arith.select %294, %295, %296 : vector<2x48xi1>, vector<2x48xf32>
    %298 = arith.truncf %297 : vector<2x48xf32> to vector<2x48xbf16>
    %299 = arith.truncf %290 : vector<48x32xf32> to vector<48x32xbf16>
    %cst_89 = arith.constant dense<0.000000e+00> : vector<2x32xf32>
    %300 = tpu.matmul %298, %299, %cst_89 {dimension_numbers = #tpu.dot_dimension_numbers<[1], [0], [0], [1], [0, 0, 1, 1], [], []>} : vector<2x48xbf16>, vector<48x32xbf16>, vector<2x32xf32> -> vector<2x32xf32>
    %c888 = arith.constant 888 : index
    %c0_90 = arith.constant 0 : index
    %301 = vector.load %arg1[%c888, %c0_90] : memref<920x96xbf16, #tpu.memory_space<vmem>>, vector<32x32xbf16>
    %302 = arith.truncf %300 : vector<2x32xf32> to vector<2x32xbf16>
    %cst_91 = arith.constant dense<0.000000e+00> : vector<2x32xf32>
    %303 = tpu.matmul %302, %301, %cst_91 {dimension_numbers = #tpu.dot_dimension_numbers<[1], [0], [0], [1], [0, 0, 1, 1], [], []>} : vector<2x32xbf16>, vector<32x32xbf16>, vector<2x32xf32> -> vector<2x32xf32>
    %304 = vector.extract_strided_slice %303 {offsets = [0, 0], sizes = [2, 2], strides = [1, 1]} : vector<2x32xf32> to vector<2x2xf32>
    %c8 = arith.constant 8 : index
    %c0_92 = arith.constant 0 : index
    %305 = vector.load %arg2[%c8, %c0_92] : memref<16x96xf32, #tpu.memory_space<vmem>>, vector<1x2xf32>
    %306 = vector.broadcast %305 : vector<1x2xf32> to vector<2x2xf32>
    %307 = arith.addf %304, %306 : vector<2x2xf32>
    %c0_93 = arith.constant 0 : index
    %c0_94 = arith.constant 0 : index
    %308 = vector.load %arg3[%c0_93, %c0_94] : memref<2x2xf32, #tpu.memory_space<vmem>>, vector<2x2xf32>
    tpu.vector_store %arg3[%c0_93, %c0_94], %307 {strides = array<i32>} : memref<2x2xf32, #tpu.memory_space<vmem>>, vector<2x2xf32>,
    return
  }
}

</mosaic_0001>

<bundles_post_ra>
// kernel: yield_benchmark_forward.1
= control target key start
LH: loop header
LB: loop body
LE: loop exit
PB: predicated region body
PF: predicated region fallthrough
CT: control target
= control target key end

     0   :  { %v3983_v34 = vmov 0   ;;  %vm1433_vm0 = vcmask 719872   ;;  %vm1443_vm1 = vcmask 1043456   ;;  %s4965_s0 = inlined_call_operand.vmem [shape: bf16[48,728], index: 0, kind: input, shape index: {}]   ;;  %s4966_s1 = inlined_call_operand.vmem [shape: bf16[920,96], index: 1, kind: input, shape index: {}]   ;;  %s4967_s2 = inlined_call_operand.vmem [shape: f32[16,96], index: 2, kind: input, shape index: {}]   ;;  %s4968_s3 = inlined_call_operand.hbm [shape: f32[2,2], index: 3, kind: output, shape index: {}]  }
   0x1   :  { %v3744_v0 = vld [vmem:[%s4966_s1 + $0x78] sm:$0xff]   ;;  %v3748_v4 = vld [vmem:[%s4966_s1 + $0x70] sm:$0xff]   ;;  %v3752_v8 = vld [vmem:[%s4966_s1 + $0x68] sm:$0xff]  }
   0x2   :  { %v3745_v1 = vld [vmem:[%s4966_s1 + $0xf8] sm:$0xff]   ;;  %3462 = vmatprep.subr.bf16.mxu0 %v3744_v0  ;;  %v3749_v5 = vld [vmem:[%s4966_s1 + $0xf0] sm:$0xff]   ;;  %v3753_v9 = vld [vmem:[%s4966_s1 + $0xe8] sm:$0xff]  }
   0x3   :  { %v3746_v2 = vld [vmem:[%s4966_s1 + $0x38] sm:$0xff]   ;;  %3496 = vmatprep.subr.bf16.mxu1 %v3745_v1  ;;  %v3750_v6 = vld [vmem:[%s4966_s1 + $0x30] sm:$0xff]   ;;  %v3754_v10 = vld [vmem:[%s4966_s1 + $0x28] sm:$0xff]  }
   0x4   :  { %v3747_v3 = vld [vmem:[%s4966_s1 + $0xb8] sm:$0xff]   ;;  %3463 = vmatpush3.bf16.msra.mxu0 %v3746_v2  ;;  %v3751_v7 = vld [vmem:[%s4966_s1 + $0xb0] sm:$0xff]   ;;  %v3755_v11 = vld [vmem:[%s4966_s1 + $0xa8] sm:$0xff]  }
   0x5   :  { %3497 = vmatpush3.bf16.msra.mxu1 %v3747_v3  ;;  %3464 = vmatprep.subr.bf16.mxu0 %v3748_v4  ;;  %v3756_v12 = vld [vmem:[%s4966_s1 + $0x60] sm:$0xff]   ;;  %v3760_v16 = vld [vmem:[%s4966_s1 + $0x58] sm:$0xff]   ;;  %v3764_v20 = vld [vmem:[%s4966_s1 + $0x50] sm:$0xff]  }
   0x6   :  { %3498 = vmatprep.subr.bf16.mxu1 %v3749_v5  ;;  %v3757_v13 = vld [vmem:[%s4966_s1 + $0xe0] sm:$0xff]   ;;  %v3761_v17 = vld [vmem:[%s4966_s1 + $0xd8] sm:$0xff]   ;;  %v3765_v21 = vld [vmem:[%s4966_s1 + $0xd0] sm:$0xff]  }
   0x7   :  { %v3758_v14 = vld [vmem:[%s4966_s1 + $0x20] sm:$0xff]   ;;  %v3762_v18 = vld [vmem:[%s4966_s1 + $0x18] sm:$0xff]   ;;  %v3766_v22 = vld [vmem:[%s4966_s1 + $0x10] sm:$0xff]  }
   0x8   :  { %3465 = vmatpush3.bf16.msra.mxu0 %v3750_v6  ;;  %v3759_v15 = vld [vmem:[%s4966_s1 + $0xa0] sm:$0xff]   ;;  %v3763_v19 = vld [vmem:[%s4966_s1 + $0x98] sm:$0xff]   ;;  %v3767_v23 = vld [vmem:[%s4966_s1 + $0x90] sm:$0xff]  }
   0x9   :  { %3499 = vmatpush3.bf16.msra.mxu1 %v3751_v7  ;;  %3466 = vmatprep.subr.bf16.mxu0 %v3752_v8  ;;  %v3768_v24 = vld [vmem:[%s4966_s1 + $0x48] sm:$0xff]   ;;  %v3772_v28 = vld [vmem:[%s4966_s1 + $0x40] sm:$0xff]   ;;  %v3782_v37 = vld [vmem:[%s4966_s1 + $0x138] sm:$0xff]  }
   0xa   :  { %3500 = vmatprep.subr.bf16.mxu1 %v3753_v9  ;;  %v3769_v25 = vld [vmem:[%s4966_s1 + $0xc8] sm:$0xff]   ;;  %v3773_v29 = vld [vmem:[%s4966_s1 + $0xc0] sm:$0xff]   ;;  %v3783_v38 = vld [vmem:[%s4966_s1 + $0x130] sm:$0xff]  }
   0xb   :  { %v3770_v26 = vld [vmem:[%s4966_s1 + $0x8] sm:$0xff]   ;;  %v3774_v30 = vld [vmem:[%s4966_s1] sm:$0xff]   ;;  %v3792_v41 = vld [vmem:[%s4965_s0 + $0x3c] ss:$24 sps:$4 sm:$0xff]  }
   0xc   :  { %3467 = vmatpush3.bf16.msra.mxu0 %v3754_v10  ;;  %v3771_v27 = vld [vmem:[%s4966_s1 + $0x88] sm:$0xff]   ;;  %v3775_v31 = vld [vmem:[%s4966_s1 + $0x80] sm:$0xff]   ;;  %v3796_v44 = vld [vmem:[%s4965_s0 + $0x38] ss:$24 sps:$4 sm:$0xff]  }
   0xd   :  { %3501 = vmatpush3.bf16.msra.mxu1 %v3755_v11  ;;  %3468 = vmatprep.subr.bf16.mxu0 %v3756_v12  ;;  %v3776_v32 = vld [vmem:[%s4965_s0] ss:$24 sps:$4 sm:$0xff]   ;;  %v3778_v33 = vld [vmem:[%s4965_s0 + $0x4] ss:$24 sps:$4 sm:$0xff]   ;;  %v3784_v39 = vld [vmem:[%s4966_s1 + $0x128] sm:$0xff]  }
   0xe   :  { %3502 = vmatprep.subr.bf16.mxu1 %v3757_v13  ;;  %v3779_v35 = vld [vmem:[%s4965_s0 + $0x8] ss:$24 sps:$4 sm:$0xff]   ;;  %v3781_v36 = vld [vmem:[%s4965_s0 + $0xc] ss:$24 sps:$4 sm:$0xff]   ;;  %1479 = vmatprep.mubr.bf16.mxu0 %v3778_v33  ;;  %v3786_v47 = vld [vmem:[%s4966_s1 + $0x118] sm:$0xff]  }
   0xf   :  { %1536 = vmatprep.mubr.bf16.mxu1 %v3781_v36  ;;  %v3790_v40 = vld [vmem:[%s4965_s0 + $0x34] ss:$24 sps:$4 sm:$0xff]   ;;  %v3785_v42 = vld [vmem:[%s4966_s1 + $0x120] sm:$0xff]   ;;  %v3795_v43 = vld [vmem:[%s4965_s0 + $0x30] ss:$24 sps:$4 sm:$0xff]  }
  0x10   :  { %3469 = vmatpush3.bf16.msra.mxu0 %v3758_v14  ;;  %v3798_v45 = vld [vmem:[%s4965_s0 + $0x64] ss:$24 sps:$4 sm:$0xff]   ;;  %v3803_v48 = vld [vmem:[%s4965_s0 + $0x60] ss:$24 sps:$4 sm:$0xff]   ;;  %v3787_v50 = vld [vmem:[%s4966_s1 + $0x110] sm:$0xff]  }
  0x11   :  { %3503 = vmatpush3.bf16.msra.mxu1 %v3759_v15  ;;  %3470 = vmatprep.subr.bf16.mxu0 %v3760_v16  ;;  %v3800_v46 = vld [vmem:[%s4965_s0 + $0x6c] ss:$24 sps:$4 sm:$0xff]   ;;  %v3804_v49 = vld [vmem:[%s4965_s0 + $0x68] ss:$24 sps:$4 sm:$0xff]  }
  0x12   :  { %3504 = vmatprep.subr.bf16.mxu1 %v3761_v17  ;;  %v3810_v51 = vld [vmem:[%s4965_s0 + $0x14] ss:$24 sps:$4 sm:$0xff]   ;;  %v3789_v53 = vld [vmem:[%s4966_s1 + $0x100] sm:$0xff]   ;;  %v3794_v54 = vld [vmem:[%s4966_s1 + $0x168] ss:$0 sps:$4 sm:$0xff]  }
  0x13   :  { %v3788_v52 = vld [vmem:[%s4966_s1 + $0x108] sm:$0xff]  }
  0x14   :  { %3471 = vmatpush3.bf16.msra.mxu0 %v3762_v18 }
  0x15   :  { %3505 = vmatpush3.bf16.msra.mxu1 %v3763_v19  ;;  %3472 = vmatprep.subr.bf16.mxu0 %v3764_v20 }
  0x16   :  { %3506 = vmatprep.subr.bf16.mxu1 %v3765_v21 }
  0x18   :  { %3473 = vmatpush3.bf16.msra.mxu0 %v3766_v22 }
  0x19   :  { %3507 = vmatpush3.bf16.msra.mxu1 %v3767_v23  ;;  %3474 = vmatprep.subr.bf16.mxu0 %v3768_v24 }
  0x1a   :  { %3508 = vmatprep.subr.bf16.mxu1 %v3769_v25 }
  0x1c   :  { %3475 = vmatpush3.bf16.msra.mxu0 %v3770_v26 }
  0x1d   :  { %3509 = vmatpush3.bf16.msra.mxu1 %v3771_v27  ;;  %3476 = vmatprep.subr.bf16.mxu0 %v3772_v28 }
  0x1e   :  { %3510 = vmatprep.subr.bf16.mxu1 %v3773_v29 }
  0x20   :  { %3477 = vmatpush3.bf16.msra.mxu0 %v3774_v30 }
  0x21   :  { %3511 = vmatpush3.bf16.msra.mxu1 %v3775_v31  ;;  %1561 = vmatprep.subr.bf16.mxu0 %v3983_v34 }
  0x23   :  { %1480 = vmatmul.mubr.bf16.vlgmr.msra.gmra.mxu0 %v3776_v32 }
  0x24   :  { %1537 = vmatmul.mubr.bf16.vlgmr.msra.gmra.mxu1 %v3779_v35  ;;  %1562 = vmatpush1.bf16.msra.mxu0 %v3782_v37 }
  0x25   :  { %1563 = vmatprep.subr.bf16.mxu0 %v3983_v34  ;;  %1487 = vmatprep.mubr.bf16.mxu0 %v3790_v40 }
  0x26   :  { %1544 = vmatprep.mubr.bf16.mxu1 %v3792_v41 }
  0x28   :  { %1564 = vmatpush1.bf16.msra.mxu0 %v3783_v38 }
  0x29   :  { %1565 = vmatprep.subr.bf16.mxu0 %v3983_v34 }
  0x2b   :  { %1488 = vmatmul.mubr.bf16.gmra.mxu0 %v3795_v43 }
  0x2c   :  { %1566 = vmatpush1.bf16.msra.mxu0 %v3784_v39  ;;  %1545 = vmatmul.mubr.bf16.gmra.mxu1 %v3796_v44 }
  0x2d   :  { %1567 = vmatprep.subr.bf16.mxu0 %v3983_v34  ;;  %1495 = vmatprep.mubr.bf16.mxu0 %v3798_v45 }
  0x2e   :  { %1552 = vmatprep.mubr.bf16.mxu1 %v3800_v46 }
  0x30   :  { %1568 = vmatpush1.bf16.msra.mxu0 %v3785_v42 }
  0x31   :  { %1569 = vmatprep.subr.bf16.mxu0 %v3983_v34 }
  0x33   :  { %1496 = vmatmul.mubr.bf16.gmra.mxu0 %v3803_v48 }
  0x34   :  { %1570 = vmatpush1.bf16.msra.mxu0 %v3786_v47  ;;  %1553 = vmatmul.mubr.bf16.gmra.mxu1 %v3804_v49 }
  0x35   :  { %1571 = vmatprep.subr.bf16.mxu0 %v3983_v34  ;;  %3368 = vmatprep.mubr.msk.bf16.mxu0 %vm1433_vm0, %v3810_v51 }
  0x38   :  { %1572 = vmatpush1.bf16.msra.mxu0 %v3787_v50 }
  0x39   :  { %1573 = vmatprep.subr.bf16.mxu0 %v3983_v34 }
  0x3c   :  { %1574 = vmatpush1.bf16.msra.mxu0 %v3788_v52 }
  0x3d   :  { %1575 = vmatprep.subr.bf16.mxu0 %v3983_v34 }
  0x40   :  { %1576 = vmatpush1.bf16.msra.mxu0 %v3789_v53 }
  0x41   :  { %8 = vsyncpa [#allocation3], 0  ;;  %1581 = vmatprep.subr.bf16.mxu0 %v3983_v34  ;;  %v1445_v55 = vsel %vm1443_vm1, %v3794_v54, 0  ;;  %v3797_v56 = vld [vmem:[%s4966_s1 + $0x160] sm:$0xff]   ;;  %v3802_v57 = vld [vmem:[%s4966_s1 + $0x158] sm:$0xff]   ;;  %vm1620_vm2 = vcmask 261120  }
  0x42   :  { %v3805_v58 = vld [vmem:[%s4966_s1 + $0x150] sm:$0xff]   ;;  %v3806_v59 = vld [vmem:[%s4966_s1 + $0x148] sm:$0xff]   ;;  %v3807_v60 = vld [vmem:[%s4966_s1 + $0x140] sm:$0xff]   ;;  %vm3985_vm3 = vmmov 0   ;;  %s3986_s14 = smov 96   ;;  %s3987_s15 = smov 64  }
  0x43   :  { %v3808_v61 = vld [vmem:[%s4965_s0 + $0x10] ss:$24 sps:$4 sm:$0xff]   ;;  %v3811_v62 = vld [vmem:[%s4965_s0 + $0x44] ss:$24 sps:$4 sm:$0xff]   ;;  %v3813_v63 = vld [vmem:[%s4965_s0 + $0x40] ss:$24 sps:$4 sm:$0xff]  }
  0x44   :  { %1582 = vmatpush2.bf16.msra.mxu0 %v1445_v55  ;;  %v3814_v0 = vld [vmem:[%s4965_s0 + $0x74] ss:$24 sps:$4 sm:$0xff]   ;;  %v3816_v1 = vld [vmem:[%s4965_s0 + $0x70] ss:$24 sps:$4 sm:$0xff]   ;;  %s3988_s19 = smov [#allocation2]  }
  0x45   :  { %1583 = vmatprep.subr.bf16.mxu0 %v3983_v34  ;;  %s3203_s20 = sshll.u32 %s3988_s19, 4  ;;  %s3204_s20 = int_to_ptr.vmem [resolvable:$true] %s3203_s20 }
  0x46   :  { %s3961_s21 = scalar_lea.vmem %s3204_s20, 32  ;;  %p3966_p1 = scmp.lt.s32.totalorder %s3204_s20, %s3204_s20 }
  0x47   :  { %p3962_p0 = scmp.ne.s32.totalorder %s3204_s20, %s3961_s21  ;;  %p3967_p2 = scmp.lt.s32.totalorder %s3961_s21, %s3961_s21 }
  0x48   :  { %1584 = vmatpush2.bf16.msra.mxu0 %v3797_v56 }
  0x49   :  { %1585 = vmatprep.subr.bf16.mxu0 %v3983_v34  ;;  %p3968_p3 = por %p3967_p2, %p3966_p1 }
  0x4b   :  { %p3969_p4 = pnand %p3968_p3, %p3962_p0 }
  0x4c   :  { %1586 = vmatpush2.bf16.msra.mxu0 %v3802_v57 }
  0x4d   :  { %1587 = vmatprep.subr.bf16.mxu0 %v3983_v34 }
  0x50   :  { %1588 = vmatpush2.bf16.msra.mxu0 %v3805_v58 }
  0x51   :  { %1589 = vmatprep.subr.bf16.mxu0 %v3983_v34 }
  0x54   :  { %1590 = vmatpush2.bf16.msra.mxu0 %v3806_v59 }
  0x55   :  { %1591 = vmatprep.subr.bf16.mxu0 %v3983_v34 }
  0x58   :  { %1592 = vmatpush2.bf16.msra.mxu0 %v3807_v60 }
  0x5b   :  { %1594 = vmatmul.mubr.bf16.vlgmr.msra.gmra.mxu0 %v3808_v61 }
  0x5c   :  { %3369 = vmatprep.mubr.msk.bf16.mxu0 %vm1433_vm0, %v3811_v62 }
  0x63   :  { %1602 = vmatmul.mubr.bf16.gmra.mxu0 %v3813_v63 }
  0x64   :  { %3370 = vmatprep.mubr.msk.bf16.mxu0 %vm1433_vm0, %v3814_v0 }
  0x6b   :  { %1610 = vmatmul.mubr.bf16.gmra.mxu0 %v3816_v1 }
  0xe3   :  { %v3478_v2 = vpop.f32.mrf.mxu0 }
  0xe4   :  { %v3512_v6 = vpop.f32.mrf.mxu1 }
  0xe5   :  { %v3479_v3 = vpop.f32.mrf.mxu0 }
  0xe6   :  { %v3513_v8 = vpop.f32.mrf.mxu1  ;;  %v3480_v20 = vadd.f32 %v3479_v3, %v3478_v2 }
  0xe7   :  { %v3481_v4 = vpop.f32.mrf.mxu0  ;;  %v3514_v21 = vadd.f32 %v3513_v8, %v3512_v6 }
  0xe8   :  { %v3515_v10 = vpop.f32.mrf.mxu1 }
  0xe9   :  { %v3482_v5 = vpop.f32.mrf.mxu0  ;;  %v1539_v26 = vadd.f32 %v3514_v21, %v3480_v20 }
  0xea   :  { %v3516_v12 = vpop.f32.mrf.mxu1  ;;  %v3483_v24 = vadd.f32 %v3482_v5, %v3481_v4 }
  0xeb   :  { %v3484_v7 = vpop.f32.mrf.mxu0  ;;  %v3517_v25 = vadd.f32 %v3516_v12, %v3515_v10 }
  0xec   :  { %v3518_v14 = vpop.f32.mrf.mxu1 }
  0xed   :  { %v3485_v9 = vpop.f32.mrf.mxu0  ;;  %v1542_v33 = vadd.f32 %v3517_v25, %v3483_v24 }
  0xee   :  { %v3519_v16 = vpop.f32.mrf.mxu1  ;;  %v3486_v31 = vadd.f32 %v3485_v9, %v3484_v7 }
  0xef   :  { %v3487_v11 = vpop.f32.mrf.mxu0  ;;  %v3520_v32 = vadd.f32 %v3519_v16, %v3518_v14 }
  0xf0   :  { %v3521_v18 = vpop.f32.mrf.mxu1 }
  0xf1   :  { %v3488_v13 = vpop.f32.mrf.mxu0  ;;  %v1547_v42 = vadd.f32 %v3520_v32, %v3486_v31 }
  0xf2   :  { %v3522_v22 = vpop.f32.mrf.mxu1  ;;  %v3489_v40 = vadd.f32 %v3488_v13, %v3487_v11 }
  0xf3   :  { %v3490_v15 = vpop.f32.mrf.mxu0  ;;  %v3523_v41 = vadd.f32 %v3522_v22, %v3521_v18 }
  0xf4   :  { %v3524_v27 = vpop.f32.mrf.mxu1 }
  0xf5   :  { %v3491_v17 = vpop.f32.mrf.mxu0  ;;  %v1550_v50 = vadd.f32 %v3523_v41, %v3489_v40  ;;  %v3818_v40 = vld [vmem:[%s4966_s1 + $0x16c] sm:$0xff]  }
  0xf6   :  { %v3525_v36 = vpop.f32.mrf.mxu1  ;;  %v3492_v48 = vadd.f32 %v3491_v17, %v3490_v15 }
  0xf7   :  { %v3493_v19 = vpop.f32.mrf.mxu0  ;;  %v3526_v49 = vadd.f32 %v3525_v36, %v3524_v27 }
  0xf8   :  { %v3527_v44 = vpop.f32.mrf.mxu1 }
  0xf9   :  { %v3494_v23 = vpop.f32.mrf.mxu0  ;;  %v1555_v58 = vadd.f32 %v3526_v49, %v3492_v48 }
  0xfa   :  { %v3528_v52 = vpop.f32.mrf.mxu1  ;;  %v3495_v56 = vadd.f32 %v3494_v23, %v3493_v19 }
  0xfb   :  { %v3529_v57 = vadd.f32 %v3528_v52, %v3527_v44 }
  0xfd   :  { %v1558_v63 = vadd.f32 %v3529_v57, %v3495_v56 }
 0x11b   :  { %v1595_v28 = vpop.f32.mrf.mxu0 }
 0x11c   :  { %v4218_v29 = vadd.f32 %v1595_v28, %v1539_v26 }
 0x11d   :  { %v1597_v30 = vpop.f32.mrf.mxu0 }
 0x11e   :  { %v1621_v35 = vsel %vm1620_vm2, %v4218_v29, 0.0 }
 0x11f   :  { %v1598_v37 = vpop.f32.mrf.mxu0  ;;  %1622 = vadd.xlane.f32.xlu0 %v1621_v35 }
 0x120   :  { %v4222_v38 = vadd.f32 %v1598_v37, %v1542_v33  ;;  %v3817_v37 = vld [vmem:[%s4966_s1 + $0x174] sm:$0xff]  }
 0x121   :  { %v1600_v39 = vpop.f32.mrf.mxu0 }
 0x122   :  { %v1624_v43 = vsel %vm1620_vm2, %v4222_v38, 0.0  ;;  %v3984_v39 = vmov 0.0  }
 0x123   :  { %v1603_v45 = vpop.f32.mrf.mxu0  ;;  %1625 = vadd.xlane.f32.xlu0 %v1624_v43  ;;  %3589 = vmatprep.subr.bf16.mxu1 %v3984_v39 }
 0x124   :  { %v4226_v46 = vadd.f32 %v1603_v45, %v1547_v42  ;;  %3590 = vmatpush3.bf16.msra.mxu1 %v3817_v37  ;;  %3593 = vmatprep.mubr.msk.bf16.mxu1 %vm3985_vm3, %v3984_v39 }
 0x125   :  { %v1605_v47 = vpop.f32.mrf.mxu0  ;;  %3591 = vmatprep.subr.bf16.mxu1 %v3984_v39 }
 0x126   :  { %v1627_v51 = vsel %vm1620_vm2, %v4226_v46, 0.0 }
 0x127   :  { %v1606_v53 = vpop.f32.mrf.mxu0  ;;  %1628 = vadd.xlane.f32.xlu1 %v1627_v51 }
 0x128   :  { %v4230_v54 = vadd.f32 %v1606_v53, %v1550_v50  ;;  %3592 = vmatpush3.bf16.msra.mxu1 %v3818_v40 }
 0x129   :  { %v1608_v55 = vpop.f32.mrf.mxu0 }
 0x12a   :  { %v1630_v59 = vsel %vm1620_vm2, %v4230_v54, 0.0 }
 0x12b   :  { %v1611_v60 = vpop.f32.mrf.mxu0  ;;  %1631 = vadd.xlane.f32.xlu1 %v1630_v59 }
 0x12c   :  { %v4234_v61 = vadd.f32 %v1611_v60, %v1555_v58  ;;  %v3371_v60 = vld [vmem:[%s4967_s2] ss:$0 sm:$0xff] }
 0x12d   :  { %v1613_v62 = vpop.f32.mrf.mxu0 }
 0x12e   :  { %v1633_v0 = vsel %vm1620_vm2, %v4234_v61, 0.0 }
 0x12f   :  { %v1614_v1 = vpop.f32.mrf.mxu0  ;;  %1634 = vadd.xlane.f32.xlu0 %v1633_v0 }
 0x130   :  { %v4238_v2 = vadd.f32 %v1614_v1, %v1558_v63 }
 0x131   :  { %v1616_v3 = vpop.f32.mrf.mxu0 }
 0x132   :  { %v1636_v4 = vsel %vm1620_vm2, %v4238_v2, 0.0 }
 0x133   :  { %1637 = vadd.xlane.f32.xlu1 %v1636_v4 }
 0x1a8   :  { %v1623_v5 = vpop.xlane.xlu0 %1622 }
 0x1a9   :  { %v1640_v6 = vmul.f32 0.03125, %v1623_v5  ;;  %v3372_v5 = vld [vmem:[%s4967_s2 + $0x1] ss:$0 sm:$0xff] }
 0x1ab   :  { %v1646_v7 = vsub.f32 %v4218_v29, %v1640_v6 }
 0x1ac   :  { %v1626_v8 = vpop.xlane.xlu0 %1625 }
 0x1ad   :  { %v1641_v9 = vmul.f32 0.03125, %v1626_v8  ;;  %v1652_v10 = vmul.f32 %v1646_v7, %v1646_v7 }
 0x1af   :  { %v4244_v11 = vsub.f32 %v4222_v38, %v1641_v9  ;;  %v1658_v12 = vsel %vm1620_vm2, %v1652_v10, 0.0 }
 0x1b0   :  { %v1629_v13 = vpop.xlane.xlu1 %1628  ;;  %1659 = vadd.xlane.f32.xlu0 %v1658_v12 }
 0x1b1   :  { %v1642_v14 = vmul.f32 0.03125, %v1629_v13  ;;  %v1653_v15 = vmul.f32 %v4244_v11, %v4244_v11 }
 0x1b3   :  { %v4250_v16 = vsub.f32 %v4226_v46, %v1642_v14  ;;  %v1661_v17 = vsel %vm1620_vm2, %v1653_v15, 0.0 }
 0x1b4   :  { %v1632_v18 = vpop.xlane.xlu1 %1631  ;;  %1662 = vadd.xlane.f32.xlu1 %v1661_v17 }
 0x1b5   :  { %v1643_v19 = vmul.f32 0.03125, %v1632_v18  ;;  %v1654_v20 = vmul.f32 %v4250_v16, %v4250_v16 }
 0x1b7   :  { %v4256_v21 = vsub.f32 %v4230_v54, %v1643_v19  ;;  %v1664_v22 = vsel %vm1620_vm2, %v1654_v20, 0.0 }
 0x1b8   :  { %1665 = vadd.xlane.f32.xlu0 %v1664_v22  ;;  %v1635_v23 = vpop.xlane.xlu0 %1634 }
 0x1b9   :  { %v1644_v24 = vmul.f32 0.03125, %v1635_v23  ;;  %v1655_v25 = vmul.f32 %v4256_v21, %v4256_v21 }
 0x1bb   :  { %v4262_v26 = vsub.f32 %v4234_v61, %v1644_v24  ;;  %v1667_v27 = vsel %vm1620_vm2, %v1655_v25, 0.0 }
 0x1bc   :  { %v1638_v28 = vpop.xlane.xlu1 %1637  ;;  %1668 = vadd.xlane.f32.xlu1 %v1667_v27 }
 0x1bd   :  { %v1645_v30 = vmul.f32 0.03125, %v1638_v28  ;;  %v1656_v31 = vmul.f32 %v4262_v26, %v4262_v26 }
 0x1bf   :  { %v4268_v32 = vsub.f32 %v4238_v2, %v1645_v30  ;;  %v1670_v33 = vsel %vm1620_vm2, %v1656_v31, 0.0  ;;  %v16_v30 = vlaneseq }
 0x1c0   :  { %1671 = vadd.xlane.f32.xlu0 %v1670_v33 }
 0x1c1   :  { %v1657_v35 = vmul.f32 %v4268_v32, %v4268_v32  ;;  %v17_v31 = vand.u32 127, %v16_v30 }
 0x1c3   :  { %v1673_v36 = vsel %vm1620_vm2, %v1657_v35, 0.0  ;;  %vm24_vm4 = vcmp.ge.s32.totalorder %v17_v31, 8  ;;  %vm31_vm5 = vcmp.ge.s32.totalorder %v17_v31, 16  ;;  %vm19_vm6 = vcmp.lt.s32.totalorder %v17_v31, 8 }
 0x1c4   :  { %1674 = vadd.xlane.f32.xlu1 %v1673_v36  ;;  %vm21_vm7 = vcmp.ge.s32.totalorder %v17_v31, 4  ;;  %vm25_vm8 = vcmp.lt.s32.totalorder %v17_v31, 16  ;;  %vm32_vm10 = vcmp.lt.s32.totalorder %v17_v31, 40  ;;  %v3212_v35 = vadd.s32 4294967280, %v17_v31 }
 0x1c5   :  { %vm4305_vm9 = vmand %vm24_vm4, %vm25_vm8  ;;  %vm38_vm11 = vcmp.ge.s32.totalorder %v17_v31, 40  ;;  %vm39_vm14 = vcmp.lt.s32.totalorder %v17_v31, 48  ;;  %v3213_v37 = vadd.s32 4294967256, %v17_v31 }
 0x1c6   :  { %vm33_vm13 = vmand %vm31_vm5, %vm32_vm10  ;;  %vm35_vm15 = vcmp.ge.s32.totalorder %v3212_v35, 12 }
 0x1c7   :  { %vm40_vm0 = vmand %vm38_vm11, %vm39_vm14  ;;  %vm42_vm1 = vcmp.ge.s32.totalorder %v3213_v37, 4  ;;  %vm2104_vm14 = vcmask 392192  }
 0x239   :  { %v1660_v41 = vpop.xlane.xlu0 %1659 }
 0x23a   :  { %v1676_v42 = vmul.f32 0.03125, %v1660_v41 }
 0x23c   :  { %v1682_v43 = vadd.f32 1e-05, %v1676_v42  ;;  %v36_v42 = vsel %vm35_vm15, 1, %v3983_v34 }
 0x23d   :  { %v1663_v44 = vpop.xlane.xlu1 %1662 }
 0x23e   :  { %3829 = vrsqrt.f32 %v1682_v43  ;;  %v1677_v45 = vmul.f32 0.03125, %v1663_v44  ;;  %v43_v44 = vsel %vm42_vm1, 1, %v3983_v34 }
 0x240   :  { %v1683_v47 = vadd.f32 1e-05, %v1677_v45 }
 0x241   :  { %v1666_v48 = vpop.xlane.xlu0 %1665 }
 0x242   :  { %3831 = vrsqrt.f32 %v1683_v47  ;;  %v1678_v49 = vmul.f32 0.03125, %v1666_v48  ;;  %v45_v47 = vsel %vm24_vm4, 1, %v3983_v34  ;;  %v46_v48 = vsel %vm31_vm5, 1, %v3983_v34 }
 0x244   :  { %v1684_v50 = vadd.f32 1e-05, %v1678_v49  ;;  %v47_v49 = vadd.s32 %v46_v48, %v45_v47 }
 0x245   :  { %v1669_v51 = vpop.xlane.xlu1 %1668 }
 0x246   :  { %3833 = vrsqrt.f32 %v1684_v50  ;;  %v1679_v52 = vmul.f32 0.03125, %v1669_v51  ;;  %v3373_v51 = vld [vmem:[%s4967_s2 + $0x2] ss:$0 sm:$0xff] }
 0x248   :  { %v1685_v53 = vadd.f32 1e-05, %v1679_v52 }
 0x249   :  { %v1672_v55 = vpop.xlane.xlu0 %1671 }
 0x24a   :  { %3835 = vrsqrt.f32 %v1685_v53  ;;  %v1680_v56 = vmul.f32 0.03125, %v1672_v55 }
 0x24b   :  { %v3830_v57 = vpop.eup %3829 }
 0x24c   :  { %v1694_v58 = vmul.f32 %v3830_v57, %v1646_v7  ;;  %v1686_v59 = vadd.f32 1e-05, %v1680_v56 }
 0x24d   :  { %v1675_v62 = vpop.xlane.xlu1 %1674 }
 0x24e   :  { %3837 = vrsqrt.f32 %v1686_v59  ;;  %v1681_v63 = vmul.f32 0.03125, %v1675_v62  ;;  %v1704_v1 = vmul.f32 %v3371_v60, %v1694_v58 }
 0x24f   :  { %v3832_v0 = vpop.eup %3831 }
 0x250   :  { %v1695_v3 = vmul.f32 %v3832_v0, %v4244_v11  ;;  %v1687_v4 = vadd.f32 1e-05, %v1681_v63  ;;  %v1714_v8 = vadd.f32 %v3372_v5, %v1704_v1 }
 0x252   :  { %v1705_v6 = vmul.f32 %v3371_v60, %v1695_v3  ;;  %3839 = vrsqrt.f32 %v1687_v4 }
 0x253   :  { %v3834_v7 = vpop.eup %3833 }
 0x254   :  { %v1715_v9 = vadd.f32 %v3372_v5, %v1705_v6  ;;  %v1696_v10 = vmul.f32 %v3834_v7, %v4250_v16 }
 0x256   :  { %v1724_v12 = vpack.c.bf16 %v1715_v9, %v1714_v8  ;;  %v1706_v15 = vmul.f32 %v3371_v60, %v1696_v10 }
 0x257   :  { %v3836_v13 = vpop.eup %3835 }
 0x258   :  { %3594 = vmatmul.mubr.msk.bf16.vlgmr.msra.gmra.mxu1 %vm1620_vm2, %v1724_v12  ;;  %v1697_v14 = vmul.f32 %v3836_v13, %v4256_v21  ;;  %v1716_v18 = vadd.f32 %v3372_v5, %v1706_v15 }
 0x259   :  { %3597 = vmatprep.mubr.msk.bf16.mxu1 %vm3985_vm3, %v3984_v39 }
 0x25a   :  { %v1707_v11 = vmul.f32 %v3371_v60, %v1697_v14 }
 0x25b   :  { %v3838_v17 = vpop.eup %3837 }
 0x25c   :  { %v1717_v19 = vadd.f32 %v3372_v5, %v1707_v11  ;;  %v1698_v20 = vmul.f32 %v3838_v17, %v4262_v26  ;;  %v3211_v26 = vadd.s32 4294967288, %v17_v31 }
 0x25e   :  { %v1725_v22 = vpack.c.bf16 %v1717_v19, %v1716_v18  ;;  %v1708_v24 = vmul.f32 %v3371_v60, %v1698_v20  ;;  %vm28_vm12 = vcmp.ge.s32.totalorder %v3211_v26, 4 }
 0x25f   :  { %v3840_v23 = vpop.eup %3839  ;;  %v29_v40 = vsel %vm28_vm12, 1, %v3983_v34 }
 0x260   :  { %3598 = vmatmul.mubr.msk.bf16.gmra.mxu1 %vm1620_vm2, %v1725_v22  ;;  %v1699_v16 = vmul.f32 %v3840_v23, %v4268_v32  ;;  %v1718_v25 = vadd.f32 %v3372_v5, %v1708_v24  ;;  %v22_v32 = vsel %vm21_vm7, 1, %v3983_v34 }
 0x261   :  { %3601 = vmatprep.mubr.msk.bf16.mxu1 %vm3985_vm3, %v3984_v39  ;;  %v23_v36 = vsel %vm19_vm6, %v22_v32, 0  ;;  %vm48_vm6 = vcmp.ge.s32.totalorder %v17_v31, 24 }
 0x262   :  { %v1709_v21 = vmul.f32 %v3371_v60, %v1699_v16  ;;  %v30_v41 = vsel %vm4305_vm9, %v29_v40, %v23_v36  ;;  %v49_v50 = vsel %vm48_vm6, 1, %v3983_v34 }
 0x263   :  { %v37_v43 = vsel %vm33_vm13, %v36_v42, %v30_v41  ;;  %v4325_v52 = vadd.s32 %v49_v50, %v47_v49 }
 0x264   :  { %v1719_v27 = vadd.f32 %v3372_v5, %v1709_v21  ;;  %v4315_v45 = vsel %vm40_vm0, %v43_v44, %v37_v43 }
 0x265   :  { %vm3379_vm7 = vcmp.eq.s32.totalorder %v4325_v52, 0  ;;  %vm3385_vm4 = vcmp.eq.s32.totalorder %v4325_v52, 1  ;;  %vm3391_vm8 = vcmp.eq.s32.totalorder %v4325_v52, 2  ;;  %vm3397_vm5 = vcmp.eq.s32.totalorder %v4325_v52, 3 }
 0x266   :  { %v1726_v28 = vpack.c.bf16 %v1719_v27, %v1718_v25  ;;  %vm3415_vm12 = vcmp.eq.s32.totalorder %v4315_v45, 0 }
 0x268   :  { %3602 = vmatmul.mubr.msk.bf16.gmra.mxu1 %vm1620_vm2, %v1726_v28 }
 0x318   :  { %v1787_v53 = vpop.f32.mrf.mxu1 }
 0x319   :  { %v1788_v55 = vadd.f32 %v3373_v51, %v1787_v53 }
 0x31a   :  { %v3595_v56 = vpop.f32.mrf.mxu1 }
 0x31b   :  { %v1834_v60 = vsel %vm3379_vm7, %v1788_v55, 0.0  ;;  %v4335_v62 = vsel %vm3385_vm4, %v1788_v55, 0.0  ;;  %v4339_v63 = vsel %vm3391_vm8, %v1788_v55, 0.0  ;;  %v4353_v4 = vsel %vm3397_vm5, %v1788_v55, 0.0 }
 0x31c   :  { %v1790_v57 = vpop.f32.mrf.mxu1 }
 0x31d   :  { %v1791_v58 = vadd.f32 %v3373_v51, %v1790_v57 }
 0x31e   :  { %v3596_v59 = vpop.f32.mrf.mxu1 }
 0x31f   :  { %v1835_v0 = vsel %vm3379_vm7, %v1791_v58, 0.0  ;;  %v4345_v1 = vsel %vm3385_vm4, %v1791_v58, 0.0  ;;  %v4349_v3 = vsel %vm3391_vm8, %v1791_v58, 0.0  ;;  %v4361_v9 = vsel %vm3397_vm5, %v1791_v58, 0.0 }
 0x320   :  { %v1795_v5 = vpop.f32.mrf.mxu1  ;;  %v1858_v6 = vpack.c.bf16 %v1835_v0, %v1834_v60  ;;  %v1861_v7 = vpack.c.bf16 %v4345_v1, %v4335_v62  ;;  %v1864_v8 = vpack.c.bf16 %v4349_v3, %v4339_v63  ;;  %v1867_v10 = vpack.c.bf16 %v4361_v9, %v4353_v4 }
 0x321   :  { %v1796_v12 = vadd.f32 %v3373_v51, %v1795_v5  ;;  %v4385_v35 = vpack.c.bf16 %v1791_v58, %v1788_v55  ;;  %v4434_v63 = vshrl.u32 %v16_v30, 7 }
 0x322   :  { %v3599_v13 = vpop.f32.mrf.mxu1  ;;  %3611 = vmatprep.mubr.msk.bf16.mxu1 %vm1620_vm2, %v1858_v6 }
 0x323   :  { %v1836_v11 = vsel %vm3379_vm7, %v1796_v12, 0.0  ;;  %v1842_v18 = vsel %vm3385_vm4, %v1796_v12, 0.0  ;;  %v1848_v19 = vsel %vm3391_vm8, %v1796_v12, 0.0  ;;  %v1854_v20 = vsel %vm3397_vm5, %v1796_v12, 0.0 }
 0x324   :  { %v1798_v14 = vpop.f32.mrf.mxu1  ;;  %v55_v3 = vadd.s32 24, %v4434_v63  ;;  %v53_v5 = vadd.s32 8, %v4434_v63  ;;  %vm388_vm9 = vcmp.ge.s32.totalorder %v4434_v63, 4  ;;  %v63_v30 = vadd.s32 88, %v4434_v63 }
 0x325   :  { %v1799_v15 = vadd.f32 %v3373_v51, %v1798_v14  ;;  %v412_v9 = vsel %vm388_vm9, 1, %v3983_v34  ;;  %v57_v13 = vadd.s32 40, %v4434_v63 }
 0x326   :  { %v3600_v17 = vpop.f32.mrf.mxu1  ;;  %v3259_v6 = vadd.s32 4294967280, %v55_v3  ;;  %v3233_v4 = vadd.s32 4294967288, %v53_v5  ;;  %vm2056_vm13 = vcmp.eq.s32.totalorder %v412_v9, %v4315_v45 }
 0x327   :  { %v1837_v22 = vsel %vm3379_vm7, %v1799_v15, 0.0  ;;  %v4376_v23 = vpack.c.bf16 %v1799_v15, %v1796_v12  ;;  %v1843_v16 = vsel %vm3385_vm4, %v1799_v15, 0.0  ;;  %v1849_v24 = vsel %vm3391_vm8, %v1799_v15, 0.0 }
 0x328   :  { %v1859_v21 = vpack.c.bf16 %v1837_v22, %v1836_v11  ;;  %v1803_v25 = vpop.f32.mrf.mxu1  ;;  %v1862_v27 = vpack.c.bf16 %v1843_v16, %v1842_v18  ;;  %v1865_v28 = vpack.c.bf16 %v1849_v24, %v1848_v19  ;;  %v1855_v31 = vsel %vm3397_vm5, %v1799_v15, 0.0 }
 0x329   :  { %1878 = vrot.lane.b32.xlu1 %v4376_v23, %s3986_s14  ;;  %v1868_v26 = vpack.c.bf16 %v1855_v31, %v1854_v20  ;;  %v1804_v32 = vadd.f32 %v3373_v51, %v1803_v25  ;;  %vm727_vm10 = vcmp.ge.s32.totalorder %v3259_v6, 12  ;;  %vm557_vm11 = vcmp.ge.s32.totalorder %v3233_v4, 4 }
 0x32a   :  { %v3603_v33 = vpop.f32.mrf.mxu1  ;;  %v751_v14 = vsel %vm727_vm10, 1, %v3983_v34  ;;  %v581_v15 = vsel %vm557_vm11, 1, %v3983_v34  ;;  %v3219_v18 = vadd.s32 4294967248, %v63_v30  ;;  %v61_v19 = vadd.s32 72, %v4434_v63 }
 0x32b   :  { %v1838_v41 = vsel %vm3379_vm7, %v1804_v32, 0.0  ;;  %v1844_v42 = vsel %vm3385_vm4, %v1804_v32, 0.0  ;;  %v1850_v43 = vsel %vm3391_vm8, %v1804_v32, 0.0  ;;  %v1856_v44 = vsel %vm3397_vm5, %v1804_v32, 0.0 }
 0x32c   :  { %v1806_v36 = vpop.f32.mrf.mxu1  ;;  %v3285_v22 = vadd.s32 4294967256, %v57_v13  ;;  %vm2059_vm0 = vcmp.eq.s32.totalorder %v751_v14, %v4315_v45  ;;  %vm2057_vm1 = vcmp.eq.s32.totalorder %v581_v15, %v4315_v45  ;;  %v3291_v31 = vadd.s32 4294967256, %v3219_v18 }
 0x32d   :  { %v1807_v37 = vadd.f32 %v3373_v51, %v1806_v36  ;;  %1876 = vrot.lane.b32.xlu1 %v4385_v35, %s3986_s14  ;;  %v67_v33 = vadd.s32 120, %v4434_v63  ;;  %vm3416_vm11 = vcmp.eq.s32.totalorder %v4315_v45, 1  ;;  %v70_v4 = vadd.s32 144, %v4434_v63 }
 0x32e   :  { %v3604_v40 = vpop.f32.mrf.mxu1  ;;  %vm897_vm9 = vcmp.ge.s32.totalorder %v3285_v22, 4 }
 0x32f   :  { %v4396_v47 = vpack.c.bf16 %v1807_v37, %v1804_v32  ;;  %v1839_v48 = vsel %vm3379_vm7, %v1807_v37, 0.0  ;;  %v1845_v49 = vsel %vm3385_vm4, %v1807_v37, 0.0  ;;  %v1851_v50 = vsel %vm3391_vm8, %v1807_v37, 0.0 }
 0x330   :  { %v1860_v51 = vpack.c.bf16 %v1839_v48, %v1838_v41  ;;  %v1863_v53 = vpack.c.bf16 %v1845_v49, %v1844_v42  ;;  %v1866_v55 = vpack.c.bf16 %v1851_v50, %v1850_v43  ;;  %v1857_v56 = vsel %vm3397_vm5, %v1807_v37, 0.0 }
 0x331   :  { %1880 = vrot.lane.b32.xlu0 %v4396_v47, %s3986_s14  ;;  %v1869_v57 = vpack.c.bf16 %v1857_v56, %v1856_v44  ;;  %v921_v43 = vsel %vm897_vm9, 1, %v3983_v34  ;;  %v64_v49 = vadd.s32 96, %v4434_v63  ;;  %v3223_v50 = vadd.s32 4294967200, %v67_v33 }
 0x39b   :  { %v1879_v60 = vpop.permute.xlu1 %1878 }
 0x39c   :  { %v1922_v62 = vsel %vm1620_vm2, %v1879_v60, 0 }
 0x39f   :  { %v1877_v0 = vpop.permute.xlu1 %1876 }
 0x3a0   :  { %v1919_v1 = vsel %vm1620_vm2, %v1877_v0, 0 }
 0x3a3   :  { %v1881_v58 = vpop.permute.xlu0 %1880 }
 0x3a4   :  { %v1925_v59 = vsel %vm1620_vm2, %v1881_v58, 0  ;;  %3735 = vmatprep.subr.msk.bf16.mxu1 %vm1620_vm2, %v1881_v58 }
 0x3a5   :  { %3606 = vmatpush3.bf16.xpose.msra.mxu1 %v1925_v59 }
 0x3a6   :  { %3736 = vmatprep.subr.msk.bf16.mxu1 %vm1620_vm2, %v1879_v60 }
 0x3ad   :  { %3608 = vmatpush3.bf16.xpose.msra.mxu1 %v1922_v62  ;;  %v3220_v62 = vadd.s32 4294967200, %v64_v49 }
 0x3ae   :  { %3737 = vmatprep.subr.msk.bf16.mxu1 %vm1620_vm2, %v1877_v0  ;;  %v3271_v0 = vadd.s32 4294967280, %v3223_v50 }
 0x3af   :  { %vm400_vm9 = vcmp.ge.s32.totalorder %v3220_v62, 4 }
 0x3b5   :  { %3610 = vmatpush3.bf16.xpose.msra.mxu1 %v1919_v1 }
 0x3b6   :  { %3665 = vmatprep.subr.bf16.mxu1 %v3984_v39 }
 0x3bc   :  { %3612 = vmatmul.mubr.msk.bf16.vlgmr.msra.gmra.mxu1 %vm1620_vm2, %v1859_v21 }
 0x3bd   :  { %3615 = vmatprep.mubr.msk.bf16.mxu1 %vm1620_vm2, %v1860_v51  ;;  %v65_v51 = vadd.s32 104, %v4434_v63 }
 0x3bf   :  { %v3221_v1 = vadd.s32 4294967200, %v65_v51 }
 0x3c1   :  { %v3245_v30 = vadd.s32 4294967288, %v3221_v1 }
 0x3c4   :  { %3616 = vmatmul.mubr.msk.bf16.gmra.mxu1 %vm1620_vm2, %v1861_v7  ;;  %v58_v7 = vadd.s32 48, %v4434_v63 }
 0x3c5   :  { %3619 = vmatprep.mubr.msk.bf16.mxu1 %vm1620_vm2, %v1862_v27 }
 0x3cc   :  { %3620 = vmatmul.mubr.msk.bf16.gmra.mxu1 %vm1620_vm2, %v1863_v53 }
 0x3cd   :  { %3623 = vmatprep.mubr.msk.bf16.mxu1 %vm1620_vm2, %v1864_v8  ;;  %v59_v8 = vadd.s32 56, %v4434_v63 }
 0x3cf   :  { %v3215_v12 = vadd.s32 4294967248, %v59_v8 }
 0x3d1   :  { %v3239_v17 = vadd.s32 4294967288, %v3215_v12 }
 0x3d3   :  { %vm563_vm6 = vcmp.ge.s32.totalorder %v3239_v17, 4  ;;  %v69_v17 = vadd.s32 136, %v4434_v63 }
 0x3d4   :  { %3624 = vmatmul.mubr.msk.bf16.gmra.mxu1 %vm1620_vm2, %v1865_v28  ;;  %v587_v41 = vsel %vm563_vm6, 1, %v3983_v34 }
 0x3d5   :  { %3627 = vmatprep.mubr.msk.bf16.mxu1 %vm1620_vm2, %v1866_v55 }
 0x3dc   :  { %3628 = vmatmul.mubr.msk.bf16.gmra.mxu1 %vm1620_vm2, %v1867_v10  ;;  %v3214_v10 = vadd.s32 4294967248, %v58_v7 }
 0x3dd   :  { %3631 = vmatprep.mubr.msk.bf16.mxu1 %vm1620_vm2, %v1868_v26  ;;  %v3217_v26 = vadd.s32 4294967248, %v61_v19 }
 0x3de   :  { %vm394_vm15 = vcmp.ge.s32.totalorder %v3214_v10, 4  ;;  %v71_v10 = vadd.s32 152, %v4434_v63 }
 0x3df   :  { %v418_v25 = vsel %vm394_vm15, 1, %v3983_v34  ;;  %v3265_v44 = vadd.s32 4294967280, %v3217_v26  ;;  %vm2063_vm15 = vcmp.eq.s32.totalorder %v587_v41, %v4315_v45  ;;  %v3225_v26 = vadd.s32 4294967200, %v69_v17 }
 0x3e0   :  { %vm2062_vm10 = vcmp.eq.s32.totalorder %v418_v25, %v4315_v45  ;;  %v3227_v22 = vadd.s32 4294967152, %v71_v10  ;;  %v75_v41 = vadd.s32 184, %v4434_v63 }
 0x3e4   :  { %3632 = vmatmul.mubr.msk.bf16.gmra.mxu1 %vm1620_vm2, %v1869_v57 }
 0x3e5   :  { %3669 = vmatprep.mubr.msk.bf16.mxu1 %vm3985_vm3, %v3984_v39 }
 0x47c   :  { %v3613_v11 = vpop.f32.mrf.mxu1 }
 0x47d   :  { %v4451_v20 = vsel %vm3415_vm12, %v3613_v11, -1e+30  ;;  %v3226_v11 = vadd.s32 4294967152, %v70_v4 }
 0x47e   :  { %v1961_v16 = vpop.f32.mrf.mxu1  ;;  %v2111_v24 = vsel %vm2104_vm14, %v4451_v20, -inf }
 0x47f   :  { %v4456_v21 = vsel %vm2056_vm13, %v1961_v16, -1e+30  ;;  %2112 = vmax.xlane.f32.xlu0 %v2111_v24  ;;  %vm903_vm13 = vcmp.ge.s32.totalorder %v3291_v31, 4  ;;  %v424_v24 = vsel %vm400_vm9, 1, %v3983_v34 }
 0x480   :  { %v3614_v27 = vpop.f32.mrf.mxu1  ;;  %v2105_v28 = vsel %vm2104_vm14, %v4456_v21, -inf  ;;  %v927_v59 = vsel %vm903_vm13, 1, %v3983_v34 }
 0x481   :  { %v4462_v32 = vsel %vm2059_vm0, %v3614_v27, -1e+30  ;;  %2106 = vmax.xlane.f32.xlu1 %v2105_v28  ;;  %vm2061_vm0 = vcmp.eq.s32.totalorder %v921_v43, %v4315_v45  ;;  %vm2067_vm6 = vcmp.eq.s32.totalorder %v927_v59, %v4315_v45  ;;  %v3231_v59 = vadd.s32 4294967152, %v75_v41 }
 0x482   :  { %v1964_v36 = vpop.f32.mrf.mxu1  ;;  %v2114_v37 = vsel %vm2104_vm14, %v4462_v32, -inf }
 0x483   :  { %v4468_v40 = vsel %vm2057_vm1, %v1964_v36, -1e+30  ;;  %2115 = vmax.xlane.f32.xlu0 %v2114_v37  ;;  %vm733_vm1 = vcmp.ge.s32.totalorder %v3265_v44, 12  ;;  %v3251_v37 = vadd.s32 4294967288, %v3227_v22 }
 0x484   :  { %v3617_v42 = vpop.f32.mrf.mxu1  ;;  %v2108_v55 = vsel %vm2104_vm14, %v4468_v40, -inf  ;;  %v757_v9 = vsel %vm733_vm1, 1, %v3983_v34  ;;  %vm2068_vm1 = vcmp.eq.s32.totalorder %v424_v24, %v4315_v45 }
 0x485   :  { %v4473_v48 = vsel %vm2062_vm10, %v3617_v42, -1e+30  ;;  %vm739_vm10 = vcmp.ge.s32.totalorder %v3271_v0, 12  ;;  %vm2065_vm13 = vcmp.eq.s32.totalorder %v757_v9, %v4315_v45  ;;  %v3303_v9 = vadd.s32 4294967256, %v3231_v59 }
 0x486   :  { %v1977_v53 = vpop.f32.mrf.mxu1  ;;  %v2123_v56 = vsel %vm2104_vm14, %v4473_v48, -inf  ;;  %v763_v25 = vsel %vm739_vm10, 1, %v3983_v34  ;;  %vm575_vm10 = vcmp.ge.s32.totalorder %v3251_v37, 4 }
 0x487   :  { %v4484_v57 = vsel %vm3416_vm11, %v1977_v53, -1e+30  ;;  %2109 = vmax.xlane.f32.xlu0 %v2108_v55  ;;  %2124 = vmax.xlane.f32.xlu1 %v2123_v56  ;;  %v3297_v53 = vadd.s32 4294967256, %v3225_v26  ;;  %v73_v55 = vadd.s32 168, %v4434_v63  ;;  %v599_v4 = vsel %vm575_vm10, 1, %v3983_v34 }
 0x488   :  { %v3618_v58 = vpop.f32.mrf.mxu1  ;;  %v2117_v6 = vsel %vm2104_vm14, %v4484_v57, -inf }
 0x489   :  { %v4488_v60 = vsel %vm2063_vm15, %v3618_v58, -1e+30  ;;  %vm569_vm15 = vcmp.ge.s32.totalorder %v3245_v30, 4 }
 0x48a   :  { %v1980_v3 = vpop.f32.mrf.mxu1  ;;  %v2126_v5 = vsel %vm2104_vm14, %v4488_v60, -inf  ;;  %v593_v43 = vsel %vm569_vm15, 1, %v3983_v34  ;;  %vm909_vm15 = vcmp.ge.s32.totalorder %v3297_v53, 4 }
 0x48b   :  { %v4495_v7 = vsel %vm2061_vm0, %v1980_v3, -1e+30  ;;  %2127 = vmax.xlane.f32.xlu0 %v2126_v5  ;;  %2118 = vmax.xlane.f32.xlu1 %v2117_v6  ;;  %vm406_vm0 = vcmp.ge.s32.totalorder %v3226_v11, 4  ;;  %vm2069_vm9 = vcmp.eq.s32.totalorder %v593_v43, %v4315_v45  ;;  %v3229_v5 = vadd.s32 4294967152, %v73_v55 }
 0x48c   :  { %v3621_v8 = vpop.f32.mrf.mxu1  ;;  %v2120_v14 = vsel %vm2104_vm14, %v4495_v7, -inf  ;;  %v430_v44 = vsel %vm406_vm0, 1, %v3983_v34  ;;  %v933_v30 = vsel %vm909_vm15, 1, %v3983_v34  ;;  %vm2075_vm0 = vcmp.eq.s32.totalorder %v599_v4, %v4315_v45 }
 0x48d   :  { %v4502_v12 = vsel %vm3416_vm11, %v3621_v8, -1e+30  ;;  %v3277_v11 = vadd.s32 4294967280, %v3229_v5 }
 0x48e   :  { %v1993_v13 = vpop.f32.mrf.mxu1  ;;  %v2135_v15 = vsel %vm2104_vm14, %v4502_v12, -inf }
 0x48f   :  { %v4511_v18 = vsel %vm3415_vm12, %v1993_v13, -1e+30  ;;  %2121 = vmax.xlane.f32.xlu0 %v2120_v14  ;;  %2136 = vmax.xlane.f32.xlu1 %v2135_v15 }
 0x490   :  { %v3622_v19 = vpop.f32.mrf.mxu1  ;;  %v2129_v31 = vsel %vm2104_vm14, %v4511_v18, -inf }
 0x491   :  { %v4516_v16 = vsel %vm2067_vm6, %v3622_v19, -1e+30  ;;  %vm2071_vm6 = vcmp.eq.s32.totalorder %v763_v25, %v4315_v45 }
 0x492   :  { %v1996_v27 = vpop.f32.mrf.mxu1  ;;  %v2138_v28 = vsel %vm2104_vm14, %v4516_v16, -inf }
 0x493   :  { %v4524_v33 = vsel %vm2065_vm13, %v1996_v27, -1e+30  ;;  %2139 = vmax.xlane.f32.xlu0 %v2138_v28  ;;  %2130 = vmax.xlane.f32.xlu1 %v2129_v31  ;;  %vm2074_vm13 = vcmp.eq.s32.totalorder %v430_v44, %v4315_v45 }
 0x494   :  { %v3625_v36 = vpop.f32.mrf.mxu1  ;;  %v2132_v50 = vsel %vm2104_vm14, %v4524_v33, -inf }
 0x495   :  { %v4530_v42 = vsel %vm3415_vm12, %v3625_v36, -1e+30 }
 0x496   :  { %v2009_v49 = vpop.f32.mrf.mxu1  ;;  %v2147_v51 = vsel %vm2104_vm14, %v4530_v42, -inf }
 0x497   :  { %v4540_v56 = vsel %vm2068_vm1, %v2009_v49, -1e+30  ;;  %2133 = vmax.xlane.f32.xlu0 %v2132_v50  ;;  %2148 = vmax.xlane.f32.xlu1 %v2147_v51  ;;  %vm2073_vm1 = vcmp.eq.s32.totalorder %v933_v30, %v4315_v45 }
 0x498   :  { %v3626_v58 = vpop.f32.mrf.mxu1  ;;  %v2141_v3 = vsel %vm2104_vm14, %v4540_v56, -inf }
 0x499   :  { %v4543_v62 = vsel %vm2071_vm6, %v3626_v58, -1e+30  ;;  %vm915_vm6 = vcmp.ge.s32.totalorder %v3303_v9, 4 }
 0x49a   :  { %v2012_v0 = vpop.f32.mrf.mxu1  ;;  %v2150_v1 = vsel %vm2104_vm14, %v4543_v62, -inf  ;;  %v939_v31 = vsel %vm915_vm6, 1, %v3983_v34 }
 0x49b   :  { %v4550_v6 = vsel %vm2069_vm9, %v2012_v0, -1e+30  ;;  %2151 = vmax.xlane.f32.xlu0 %v2150_v1  ;;  %2142 = vmax.xlane.f32.xlu1 %v2141_v3  ;;  %vm745_vm9 = vcmp.ge.s32.totalorder %v3277_v11, 12  ;;  %vm2079_vm10 = vcmp.eq.s32.totalorder %v939_v31, %v4315_v45 }
 0x49c   :  { %v3629_v8 = vpop.f32.mrf.mxu1  ;;  %v2144_v14 = vsel %vm2104_vm14, %v4550_v6, -inf  ;;  %v769_v37 = vsel %vm745_vm9, 1, %v3983_v34 }
 0x49d   :  { %v4553_v10 = vsel %vm2074_vm13, %v3629_v8, -1e+30 }
 0x49e   :  { %v2025_v13 = vpop.f32.mrf.mxu1  ;;  %v2159_v15 = vsel %vm2104_vm14, %v4553_v10, -inf }
 0x49f   :  { %v4563_v17 = vsel %vm3416_vm11, %v2025_v13, -1e+30  ;;  %2145 = vmax.xlane.f32.xlu0 %v2144_v14  ;;  %2160 = vmax.xlane.f32.xlu1 %v2159_v15 }
 0x4a0   :  { %v3630_v19 = vpop.f32.mrf.mxu1  ;;  %v2153_v27 = vsel %vm2104_vm14, %v4563_v17, -inf }
 0x4a1   :  { %v4566_v22 = vsel %vm2075_vm0, %v3630_v19, -1e+30 }
 0x4a2   :  { %v2028_v24 = vpop.f32.mrf.mxu1  ;;  %v2162_v25 = vsel %vm2104_vm14, %v4566_v22, -inf }
 0x4a3   :  { %v4572_v28 = vsel %vm2073_vm1, %v2028_v24, -1e+30  ;;  %2163 = vmax.xlane.f32.xlu0 %v2162_v25  ;;  %2154 = vmax.xlane.f32.xlu1 %v2153_v27 }
 0x4a4   :  { %v3633_v26 = vpop.f32.mrf.mxu1  ;;  %v2156_v43 = vsel %vm2104_vm14, %v4572_v28, -inf }
 0x4a5   :  { %v4577_v36 = vsel %vm3416_vm11, %v3633_v26, -1e+30  ;;  %vm2077_vm11 = vcmp.eq.s32.totalorder %v769_v37, %v4315_v45 }
 0x4a6   :  { %v2041_v41 = vpop.f32.mrf.mxu1  ;;  %v2171_v44 = vsel %vm2104_vm14, %v4577_v36, -inf }
 0x4a7   :  { %v4587_v49 = vsel %vm3415_vm12, %v2041_v41, -1e+30  ;;  %2157 = vmax.xlane.f32.xlu0 %v2156_v43  ;;  %2172 = vmax.xlane.f32.xlu1 %v2171_v44 }
 0x4a8   :  { %v3634_v50 = vpop.f32.mrf.mxu1  ;;  %v2165_v55 = vsel %vm2104_vm14, %v4587_v49, -inf }
 0x4a9   :  { %v4590_v51 = vsel %vm2079_vm10, %v3634_v50, -1e+30 }
 0x4aa   :  { %v2044_v34 = vpop.f32.mrf.mxu1  ;;  %v2174_v53 = vsel %vm2104_vm14, %v4590_v51, -inf }
 0x4ab   :  { %v4596_v58 = vsel %vm2077_vm11, %v2044_v34, -1e+30  ;;  %2175 = vmax.xlane.f32.xlu0 %v2174_v53  ;;  %2166 = vmax.xlane.f32.xlu1 %v2165_v55 }
 0x4ac   :  { %v2168_v59 = vsel %vm2104_vm14, %v4596_v58, -inf }
 0x4af   :  { %2169 = vmax.xlane.f32.xlu0 %v2168_v59 }
 0x4bc   :  { %2385 = vrot.lane.b32.xlu1 %v4396_v47, %s3987_s15 }
 0x4c5   :  { %2383 = vrot.lane.b32.xlu0 %v4376_v23, %s3987_s15 }
 0x508   :  { %v2113_v0 = vpop.xlane.xlu0 %2112 }
 0x509   :  { %v2179_v1 = vsub.f32 %v4451_v20, %v2113_v0 }
 0x50a   :  { %v2107_v3 = vpop.xlane.xlu1 %2106 }
 0x50b   :  { %v2205_v5 = vmul.f32 1.442695, %v2179_v1  ;;  %v2177_v4 = vsub.f32 %v4456_v21, %v2107_v3 }
 0x50c   :  { %v2116_v8 = vpop.xlane.xlu0 %2115 }
 0x50d   :  { %3841 = vpow2.f32 %v2205_v5  ;;  %v2201_v9 = vmul.f32 1.442695, %v2177_v4  ;;  %v2180_v30 = vsub.f32 %v4462_v32, %v2116_v8 }
 0x50f   :  { %3843 = vpow2.f32 %v2201_v9  ;;  %v2207_v13 = vmul.f32 1.442695, %v2180_v30 }
 0x510   :  { %v2110_v14 = vpop.xlane.xlu0 %2109  ;;  %v2125_v15 = vpop.xlane.xlu1 %2124 }
 0x511   :  { %3845 = vpow2.f32 %v2207_v13  ;;  %v2178_v47 = vsub.f32 %v4468_v40, %v2110_v14  ;;  %v2183_v23 = vsub.f32 %v4473_v48, %v2125_v15 }
 0x513   :  { %v2203_v11 = vmul.f32 1.442695, %v2178_v47  ;;  %v2213_v20 = vmul.f32 1.442695, %v2183_v23 }
 0x514   :  { %v2128_v19 = vpop.xlane.xlu0 %2127  ;;  %v2119_v24 = vpop.xlane.xlu1 %2118 }
 0x515   :  { %3847 = vpow2.f32 %v2203_v11  ;;  %v2184_v21 = vsub.f32 %v4488_v60, %v2128_v19  ;;  %v2181_v25 = vsub.f32 %v4484_v57, %v2119_v24 }
 0x516   :  { %3849 = vpow2.f32 %v2213_v20 }
 0x517   :  { %v2215_v32 = vmul.f32 1.442695, %v2184_v21  ;;  %v2209_v27 = vmul.f32 1.442695, %v2181_v25 }
 0x518   :  { %v2122_v31 = vpop.xlane.xlu0 %2121  ;;  %v2137_v26 = vpop.xlane.xlu1 %2136 }
 0x519   :  { %3851 = vpow2.f32 %v2215_v32  ;;  %v2182_v37 = vsub.f32 %v4495_v7, %v2122_v31  ;;  %v2187_v40 = vsub.f32 %v4502_v12, %v2137_v26 }
 0x51a   :  { %v4613_v48 = vpop.eup %3841  ;;  %3853 = vpow2.f32 %v2209_v27 }
 0x51b   :  { %v2211_v41 = vmul.f32 1.442695, %v2182_v37  ;;  %v2221_v43 = vmul.f32 1.442695, %v2187_v40  ;;  %v2255_v60 = vsel %vm2104_vm14, %v4613_v48, 0.0 }
 0x51c   :  { %v4617_v44 = vpop.eup %3843  ;;  %v2140_v57 = vpop.xlane.xlu0 %2139  ;;  %2256 = vadd.xlane.f32.xlu1 %v2255_v60 }
 0x51d   :  { %v2131_v50 = vpop.xlane.xlu1 %2130  ;;  %3855 = vpow2.f32 %v2211_v41  ;;  %v2188_v34 = vsub.f32 %v4516_v16, %v2140_v57  ;;  %v2249_v0 = vsel %vm2104_vm14, %v4617_v44, 0.0 }
 0x51e   :  { %v2185_v7 = vsub.f32 %v4511_v18, %v2131_v50  ;;  %v4621_v53 = vpop.eup %3845  ;;  %3857 = vpow2.f32 %v2221_v43 }
 0x51f   :  { %v2223_v12 = vmul.f32 1.442695, %v2188_v34  ;;  %v2258_v59 = vsel %vm2104_vm14, %v4621_v53, 0.0 }
 0x520   :  { %v2217_v55 = vmul.f32 1.442695, %v2185_v7  ;;  %2259 = vadd.xlane.f32.xlu0 %v2258_v59  ;;  %v2134_v1 = vpop.xlane.xlu0 %2133  ;;  %2250 = vadd.xlane.f32.xlu1 %v2249_v0 }
 0x521   :  { %v2149_v3 = vpop.xlane.xlu1 %2148  ;;  %3859 = vpow2.f32 %v2223_v12  ;;  %v2186_v16 = vsub.f32 %v4524_v33, %v2134_v1 }
 0x522   :  { %v2191_v18 = vsub.f32 %v4530_v42, %v2149_v3  ;;  %v4629_v5 = vpop.eup %3847  ;;  %3861 = vpow2.f32 %v2217_v55 }
 0x523   :  { %v4631_v4 = vpop.eup %3849  ;;  %v2219_v8 = vmul.f32 1.442695, %v2186_v16  ;;  %v2252_v30 = vsel %vm2104_vm14, %v4629_v5, 0.0 }
 0x524   :  { %v2229_v9 = vmul.f32 1.442695, %v2191_v18  ;;  %2253 = vadd.xlane.f32.xlu0 %v2252_v30  ;;  %v2152_v13 = vpop.xlane.xlu0 %2151  ;;  %v2267_v14 = vsel %vm2104_vm14, %v4631_v4, 0.0 }
 0x525   :  { %v2143_v15 = vpop.xlane.xlu1 %2142  ;;  %3863 = vpow2.f32 %v2219_v8  ;;  %v2192_v33 = vsub.f32 %v4543_v62, %v2152_v13  ;;  %2268 = vadd.xlane.f32.xlu1 %v2267_v14 }
 0x526   :  { %v2189_v42 = vsub.f32 %v4540_v56, %v2143_v15  ;;  %v4639_v47 = vpop.eup %3851  ;;  %3865 = vpow2.f32 %v2229_v9 }
 0x527   :  { %v4641_v23 = vpop.eup %3853  ;;  %v2231_v11 = vmul.f32 1.442695, %v2192_v33  ;;  %v2270_v19 = vsel %vm2104_vm14, %v4639_v47, 0.0 }
 0x528   :  { %v2225_v20 = vmul.f32 1.442695, %v2189_v42  ;;  %2271 = vadd.xlane.f32.xlu0 %v2270_v19  ;;  %v2146_v24 = vpop.xlane.xlu0 %2145  ;;  %v2261_v21 = vsel %vm2104_vm14, %v4641_v23, 0.0 }
 0x529   :  { %v2161_v25 = vpop.xlane.xlu1 %2160  ;;  %3867 = vpow2.f32 %v2231_v11  ;;  %v2190_v62 = vsub.f32 %v4550_v6, %v2146_v24  ;;  %2262 = vadd.xlane.f32.xlu1 %v2261_v21 }
 0x52a   :  { %v2195_v56 = vsub.f32 %v4553_v10, %v2161_v25  ;;  %v4649_v32 = vpop.eup %3855  ;;  %3869 = vpow2.f32 %v2225_v20 }
 0x52b   :  { %v4651_v27 = vpop.eup %3857  ;;  %v2227_v31 = vmul.f32 1.442695, %v2190_v62  ;;  %v2264_v37 = vsel %vm2104_vm14, %v4649_v32, 0.0 }
 0x52c   :  { %v2237_v26 = vmul.f32 1.442695, %v2195_v56  ;;  %2265 = vadd.xlane.f32.xlu0 %v2264_v37  ;;  %v2164_v40 = vpop.xlane.xlu0 %2163  ;;  %v2279_v41 = vsel %vm2104_vm14, %v4651_v27, 0.0 }
 0x52d   :  { %v2155_v43 = vpop.xlane.xlu1 %2154  ;;  %3871 = vpow2.f32 %v2227_v31  ;;  %2280 = vadd.xlane.f32.xlu1 %v2279_v41  ;;  %v2196_v57 = vsub.f32 %v4566_v22, %v2164_v40 }
 0x52e   :  { %v2193_v6 = vsub.f32 %v4563_v17, %v2155_v43  ;;  %v4658_v10 = vpop.eup %3859  ;;  %3873 = vpow2.f32 %v2237_v26 }
 0x52f   :  { %v4660_v60 = vpop.eup %3861  ;;  %v2282_v34 = vsel %vm2104_vm14, %v4658_v10, 0.0  ;;  %v2239_v0 = vmul.f32 1.442695, %v2196_v57 }
 0x530   :  { %v2233_v50 = vmul.f32 1.442695, %v2193_v6  ;;  %2283 = vadd.xlane.f32.xlu0 %v2282_v34  ;;  %v2158_v7 = vpop.xlane.xlu0 %2157  ;;  %v2273_v12 = vsel %vm2104_vm14, %v4660_v60, 0.0 }
 0x531   :  { %v2173_v55 = vpop.xlane.xlu1 %2172  ;;  %2274 = vadd.xlane.f32.xlu1 %v2273_v12  ;;  %v2194_v1 = vsub.f32 %v4572_v28, %v2158_v7 }
 0x532   :  { %v4667_v59 = vpop.eup %3863  ;;  %3875 = vpow2.f32 %v2233_v50  ;;  %v2199_v13 = vsub.f32 %v4577_v36, %v2173_v55 }
 0x533   :  { %v4669_v17 = vpop.eup %3865  ;;  %v2276_v22 = vsel %vm2104_vm14, %v4667_v59, 0.0  ;;  %3877 = vpow2.f32 %v2239_v0  ;;  %v2235_v30 = vmul.f32 1.442695, %v2194_v1 }
 0x534   :  { %2277 = vadd.xlane.f32.xlu0 %v2276_v22  ;;  %v2176_v3 = vpop.xlane.xlu0 %2175  ;;  %v2291_v16 = vsel %vm2104_vm14, %v4669_v17, 0.0  ;;  %v2245_v11 = vmul.f32 1.442695, %v2199_v13 }
 0x535   :  { %v2167_v18 = vpop.xlane.xlu1 %2166  ;;  %2292 = vadd.xlane.f32.xlu1 %v2291_v16  ;;  %3879 = vpow2.f32 %v2235_v30  ;;  %v2200_v21 = vsub.f32 %v4590_v51, %v2176_v3 }
 0x536   :  { %v4676_v8 = vpop.eup %3867  ;;  %3881 = vpow2.f32 %v2245_v11 }
 0x537   :  { %v4678_v9 = vpop.eup %3869  ;;  %v2294_v28 = vsel %vm2104_vm14, %v4676_v8, 0.0 }
 0x538   :  { %2295 = vadd.xlane.f32.xlu0 %v2294_v28  ;;  %v2170_v14 = vpop.xlane.xlu0 %2169  ;;  %v2285_v15 = vsel %vm2104_vm14, %v4678_v9, 0.0 }
 0x539   :  { %v2386_v33 = vpop.permute.xlu1 %2385  ;;  %2286 = vadd.xlane.f32.xlu1 %v2285_v15  ;;  %v2198_v20 = vsub.f32 %v4596_v58, %v2170_v14  ;;  %v2247_v58 = vmul.f32 1.442695, %v2200_v21 }
 0x53a   :  { %3635 = vmatprep.subr.bf16.mxu0 %v2386_v33  ;;  %v4685_v42 = vpop.eup %3871 }
 0x53b   :  { %3636 = vmatpush3.bf16.msra.mxu0 %v2386_v33  ;;  %v2288_v36 = vsel %vm2104_vm14, %v4685_v42, 0.0  ;;  %v4690_v19 = vpop.eup %3873  ;;  %v2243_v25 = vmul.f32 1.442695, %v2198_v20 }
 0x53c   :  { %2289 = vadd.xlane.f32.xlu0 %v2288_v36  ;;  %v2384_v24 = vpop.permute.xlu0 %2383  ;;  %v2303_v62 = vsel %vm2104_vm14, %v4690_v19, 0.0 }
 0x53d   :  { %3637 = vmatprep.subr.bf16.mxu0 %v2384_v24  ;;  %3883 = vpow2.f32 %v2243_v25 }
 0x53e   :  { %3885 = vpow2.f32 %v2247_v58 }
 0x53f   :  { %3638 = vmatpush3.bf16.msra.mxu0 %v2384_v24  ;;  %v4695_v56 = vpop.eup %3875 }
 0x540   :  { %2304 = vadd.xlane.f32.xlu0 %v2303_v62  ;;  %v2297_v31 = vsel %vm2104_vm14, %v4695_v56, 0.0  ;;  %v4699_v26 = vpop.eup %3877 }
 0x541   :  { %v2306_v37 = vsel %vm2104_vm14, %v4699_v26, 0.0 }
 0x542   :  { %v4703_v51 = vpop.eup %3879 }
 0x543   :  { %v2300_v40 = vsel %vm2104_vm14, %v4703_v51, 0.0  ;;  %v4709_v41 = vpop.eup %3881 }
 0x544   :  { %2298 = vadd.xlane.f32.xlu0 %v2297_v31  ;;  %v2315_v43 = vsel %vm2104_vm14, %v4709_v41, 0.0 }
 0x548   :  { %2307 = vadd.xlane.f32.xlu0 %v2306_v37 }
 0x54a   :  { %2381 = vrot.lane.b32.xlu1 %v4385_v35, %s3987_s15  ;;  %v4713_v6 = vpop.eup %3883  ;;  %v2197_v35 = vsub.f32 %v4587_v49, %v2167_v18 }
 0x54b   :  { %v2312_v57 = vsel %vm2104_vm14, %v4713_v6, 0.0  ;;  %v4717_v50 = vpop.eup %3885 }
 0x54c   :  { %2301 = vadd.xlane.f32.xlu0 %v2300_v40  ;;  %v2318_v34 = vsel %vm2104_vm14, %v4717_v50, 0.0  ;;  %v2241_v7 = vmul.f32 1.442695, %v2197_v35 }
 0x54e   :  { %3887 = vpow2.f32 %v2241_v7 }
 0x550   :  { %2316 = vadd.xlane.f32.xlu0 %v2315_v43 }
 0x554   :  { %2313 = vadd.xlane.f32.xlu0 %v2312_v57 }
 0x558   :  { %2319 = vadd.xlane.f32.xlu0 %v2318_v34 }
 0x55b   :  { %v4722_v12 = vpop.eup %3887 }
 0x55c   :  { %v2309_v55 = vsel %vm2104_vm14, %v4722_v12, 0.0 }
 0x56e   :  { %2310 = vadd.xlane.f32.xlu1 %v2309_v55 }
 0x5a5   :  { %v2257_v0 = vpop.xlane.xlu1 %2256 }
 0x5a9   :  { %v2260_v1 = vpop.xlane.xlu0 %2259  ;;  %v2251_v22 = vpop.xlane.xlu1 %2250 }
 0x5aa   :  { %3889 = vrcp.f32 %v2251_v22 }
 0x5ad   :  { %v2254_v3 = vpop.xlane.xlu0 %2253 }
 0x5ae   :  { %3891 = vrcp.f32 %v2254_v3  ;;  %v2269_v16 = vpop.xlane.xlu1 %2268 }
 0x5af   :  { %3893 = vrcp.f32 %v2260_v1 }
 0x5b1   :  { %v2272_v49 = vpop.xlane.xlu0 %2271 }
 0x5b2   :  { %v2263_v18 = vpop.xlane.xlu1 %2262 }
 0x5b5   :  { %v2266_v30 = vpop.xlane.xlu0 %2265 }
 0x5b6   :  { %3895 = vrcp.f32 %v2266_v30  ;;  %v2281_v13 = vpop.xlane.xlu1 %2280 }
 0x5b7   :  { %3897 = vrcp.f32 %v2257_v0  ;;  %v3890_v28 = vpop.eup %3889 }
 0x5b8   :  { %3899 = vrcp.f32 %v2263_v18  ;;  %v2345_v11 = vmul.f32 %v3890_v28, %v4617_v44 }
 0x5b9   :  { %v2284_v14 = vpop.xlane.xlu0 %2283  ;;  %3901 = vrcp.f32 %v2272_v49 }
 0x5ba   :  { %v2275_v15 = vpop.xlane.xlu1 %2274 }
 0x5bb   :  { %v3892_v33 = vpop.eup %3891 }
 0x5bc   :  { %v2346_v20 = vmul.f32 %v3892_v33, %v4629_v5  ;;  %v3894_v62 = vpop.eup %3893 }
 0x5bd   :  { %v2278_v36 = vpop.xlane.xlu0 %2277  ;;  %v2348_v43 = vmul.f32 %v3894_v62, %v4621_v53 }
 0x5be   :  { %3903 = vrcp.f32 %v2278_v36  ;;  %v2293_v24 = vpop.xlane.xlu1 %2292  ;;  %v2369_v21 = vpack.c.bf16 %v2346_v20, %v2345_v11 }
 0x5bf   :  { %3905 = vrcp.f32 %v2269_v16 }
 0x5c0   :  { %3907 = vrcp.f32 %v2275_v15  ;;  %3641 = vmatprep.mubr.msk.bf16.mxu0 %vm2104_vm14, %v2369_v21 }
 0x5c1   :  { %v2296_v25 = vpop.xlane.xlu0 %2295  ;;  %3909 = vrcp.f32 %v2284_v14 }
 0x5c2   :  { %v2287_v58 = vpop.xlane.xlu1 %2286 }
 0x5c3   :  { %v3896_v31 = vpop.eup %3895 }
 0x5c4   :  { %v3898_v37 = vpop.eup %3897  ;;  %v2350_v57 = vmul.f32 %v3896_v31, %v4649_v32 }
 0x5c5   :  { %v3900_v40 = vpop.eup %3899  ;;  %v2290_v44 = vpop.xlane.xlu0 %2289  ;;  %v2347_v35 = vmul.f32 %v3898_v37, %v4613_v48 }
 0x5c6   :  { %3911 = vrcp.f32 %v2290_v44  ;;  %v2382_v5 = vpop.permute.xlu1 %2381  ;;  %v2349_v34 = vmul.f32 %v3900_v40, %v4641_v23  ;;  %v3902_v0 = vpop.eup %3901 }
 0x5c7   :  { %3913 = vrcp.f32 %v2281_v13  ;;  %3639 = vmatprep.subr.bf16.mxu0 %v2382_v5  ;;  %v2370_v7 = vpack.c.bf16 %v2348_v43, %v2347_v35  ;;  %v2352_v3 = vmul.f32 %v3902_v0, %v4639_v47 }
 0x5c8   :  { %3915 = vrcp.f32 %v2287_v58  ;;  %3640 = vmatpush3.bf16.msra.mxu0 %v2382_v5  ;;  %v2371_v53 = vpack.c.bf16 %v2350_v57, %v2349_v34 }
 0x5c9   :  { %v2305_v55 = vpop.xlane.xlu0 %2304  ;;  %3697 = vmatprep.subr.bf16.mxu0 %v3984_v39  ;;  %3917 = vrcp.f32 %v2296_v25 }
 0x5ca   :  { %3919 = vrcp.f32 %v2293_v24 }
 0x5cb   :  { %v3904_v1 = vpop.eup %3903  ;;  %3642 = vmatmul.mubr.msk.bf16.vlgmr.msra.gmra.mxu0 %vm2104_vm14, %v2370_v7 }
 0x5cc   :  { %v3906_v22 = vpop.eup %3905  ;;  %3645 = vmatprep.mubr.msk.bf16.mxu0 %vm2104_vm14, %v2371_v53  ;;  %v2354_v16 = vmul.f32 %v3904_v1, %v4667_v59 }
 0x5cd   :  { %v3908_v32 = vpop.eup %3907  ;;  %v2299_v48 = vpop.xlane.xlu0 %2298  ;;  %v2351_v23 = vmul.f32 %v3906_v22, %v4631_v4  ;;  %v3819_v22 = vld [vmem:[%s4966_s1 + $0x184] sm:$0xff]  }
 0x5ce   :  { %v2353_v49 = vmul.f32 %v3908_v32, %v4660_v60  ;;  %v3910_v13 = vpop.eup %3909  ;;  %3921 = vrcp.f32 %v2299_v48  ;;  %3666 = vmatpush3.bf16.msra.mxu1 %v3819_v22 }
 0x5cf   :  { %v2372_v30 = vpack.c.bf16 %v2352_v3, %v2351_v23  ;;  %v2356_v59 = vmul.f32 %v3910_v13, %v4658_v10  ;;  %3667 = vmatprep.subr.bf16.mxu1 %v3984_v39 }
 0x5d0   :  { %v2373_v28 = vpack.c.bf16 %v2354_v16, %v2353_v49 }
 0x5d1   :  { %v2308_v18 = vpop.xlane.xlu0 %2307 }
 0x5d2   :  { %3923 = vrcp.f32 %v2308_v18 }
 0x5d3   :  { %v3912_v14 = vpop.eup %3911  ;;  %3646 = vmatmul.mubr.msk.bf16.gmra.mxu0 %vm2104_vm14, %v2372_v30 }
 0x5d4   :  { %v3914_v15 = vpop.eup %3913  ;;  %3649 = vmatprep.mubr.msk.bf16.mxu0 %vm2104_vm14, %v2373_v28  ;;  %v2358_v4 = vmul.f32 %v3912_v14, %v4685_v42 }
 0x5d5   :  { %v3916_v33 = vpop.eup %3915  ;;  %v2302_v47 = vpop.xlane.xlu0 %2301  ;;  %v2355_v60 = vmul.f32 %v3914_v15, %v4651_v27 }
 0x5d6   :  { %3925 = vrcp.f32 %v2302_v47  ;;  %v2357_v11 = vmul.f32 %v3916_v33, %v4678_v9  ;;  %v3918_v36 = vpop.eup %3917 }
 0x5d7   :  { %3927 = vrcp.f32 %v2305_v55  ;;  %v2374_v20 = vpack.c.bf16 %v2356_v59, %v2355_v60  ;;  %v3920_v21 = vpop.eup %3919  ;;  %v2360_v25 = vmul.f32 %v3918_v36, %v4676_v8 }
 0x5d8   :  { %v2375_v24 = vpack.c.bf16 %v2358_v4, %v2357_v11  ;;  %v2359_v10 = vmul.f32 %v3920_v21, %v4669_v17 }
 0x5d9   :  { %v2317_v43 = vpop.xlane.xlu0 %2316 }
 0x5da   :  { %v2376_v58 = vpack.c.bf16 %v2360_v25, %v2359_v10 }
 0x5db   :  { %3650 = vmatmul.mubr.msk.bf16.gmra.mxu0 %vm2104_vm14, %v2374_v20  ;;  %v3922_v62 = vpop.eup %3921 }
 0x5dc   :  { %3653 = vmatprep.mubr.msk.bf16.mxu0 %vm2104_vm14, %v2375_v24  ;;  %v2361_v9 = vmul.f32 %v3922_v62, %v4695_v56 }
 0x5dd   :  { %v2314_v8 = vpop.xlane.xlu0 %2313 }
 0x5df   :  { %v3924_v42 = vpop.eup %3923 }
 0x5e0   :  { %v2364_v40 = vmul.f32 %v3924_v42, %v4699_v26 }
 0x5e1   :  { %v2320_v57 = vpop.xlane.xlu0 %2319 }
 0x5e2   :  { %3929 = vrcp.f32 %v2320_v57 }
 0x5e3   :  { %v3926_v31 = vpop.eup %3925  ;;  %3654 = vmatmul.mubr.msk.bf16.gmra.mxu0 %vm2104_vm14, %v2376_v58  ;;  %3931 = vrcp.f32 %v2314_v8 }
 0x5e4   :  { %v3928_v27 = vpop.eup %3927  ;;  %v2362_v37 = vmul.f32 %v3926_v31, %v4703_v51  ;;  %3933 = vrcp.f32 %v2317_v43 }
 0x5e5   :  { %v2363_v5 = vmul.f32 %v3928_v27, %v4690_v19 }
 0x5e6   :  { %v2377_v44 = vpack.c.bf16 %v2362_v37, %v2361_v9 }
 0x5e7   :  { %v2378_v17 = vpack.c.bf16 %v2364_v40, %v2363_v5 }
 0x5e8   :  { %3657 = vmatprep.mubr.msk.bf16.mxu0 %vm2104_vm14, %v2377_v44 }
 0x5eb   :  { %3658 = vmatmul.mubr.msk.bf16.gmra.mxu0 %vm2104_vm14, %v2378_v17 }
 0x5ef   :  { %v3930_v56 = vpop.eup %3929 }
 0x5f0   :  { %v3932_v51 = vpop.eup %3931  ;;  %v2368_v7 = vmul.f32 %v3930_v56, %v4717_v50 }
 0x5f1   :  { %v3934_v34 = vpop.eup %3933  ;;  %v2366_v55 = vmul.f32 %v3932_v51, %v4713_v6 }
 0x5f2   :  { %v2367_v0 = vmul.f32 %v3934_v34, %v4709_v41  ;;  %v3820_v41 = vld [vmem:[%s4966_s1 + $0x17c] sm:$0xff]  }
 0x5f3   :  { %3668 = vmatpush3.bf16.msra.mxu1 %v3820_v41 }
 0x5f4   :  { %v2380_v1 = vpack.c.bf16 %v2368_v7, %v2367_v0  ;;  %3681 = vmatprep.subr.bf16.mxu1 %v3984_v39 }
 0x5f7   :  { %v2311_v35 = vpop.xlane.xlu1 %2310 }
 0x5f8   :  { %3935 = vrcp.f32 %v2311_v35 }
 0x605   :  { %v3936_v26 = vpop.eup %3935 }
 0x606   :  { %v2365_v19 = vmul.f32 %v3936_v26, %v4722_v12 }
 0x608   :  { %v2379_v53 = vpack.c.bf16 %v2366_v55, %v2365_v19 }
 0x60a   :  { %3661 = vmatprep.mubr.msk.bf16.mxu0 %vm2104_vm14, %v2379_v53 }
 0x60b   :  { %3662 = vmatmul.mubr.msk.bf16.gmra.mxu0 %vm2104_vm14, %v2380_v1 }
 0x60c   :  { %3705 = vmatprep.mubr.msk.bf16.mxu0 %vm3985_vm3, %v3984_v39 }
 0x68b   :  { %v3643_v6 = vpop.f32.mrf.mxu0 }
 0x68c   :  { %v2560_v8 = vsel %vm3379_vm7, %v3643_v6, 0.0 }
 0x68d   :  { %v2460_v50 = vpop.f32.mrf.mxu0 }
 0x68e   :  { %v2558_v60 = vsel %vm3379_vm7, %v2460_v50, 0.0 }
 0x68f   :  { %v3644_v12 = vpop.f32.mrf.mxu0 }
 0x690   :  { %v2561_v57 = vsel %vm3379_vm7, %v3644_v12, 0.0 }
 0x691   :  { %v2463_v32 = vpop.f32.mrf.mxu0 }
 0x692   :  { %v2559_v11 = vsel %vm3379_vm7, %v2463_v32, 0.0 }
 0x693   :  { %v3647_v48 = vpop.f32.mrf.mxu0 }
 0x694   :  { %v2573_v47 = vsel %vm3385_vm4, %v3647_v48, 0.0 }
 0x695   :  { %v2476_v3 = vpop.f32.mrf.mxu0  ;;  %v2579_v24 = vadd.f32 %v2573_v47, %v2558_v60  ;;  %v3440_v47 = vld [vmem:[%s4967_s2 + $0x3] ss:$0 sm:$0xff] }
 0x697   :  { %v3648_v16 = vpop.f32.mrf.mxu0 }
 0x698   :  { %v2574_v59 = vsel %vm3385_vm4, %v3648_v16, 0.0  ;;  %v2562_v16 = vsel %vm3379_vm7, %v2476_v3, 0.0 }
 0x699   :  { %v2479_v23 = vpop.f32.mrf.mxu0  ;;  %v2580_v21 = vadd.f32 %v2574_v59, %v2559_v11 }
 0x69a   :  { %v2563_v6 = vsel %vm3379_vm7, %v2479_v23, 0.0  ;;  %vm2996_vm7 = vcmask 523264  }
 0x69b   :  { %v3651_v49 = vpop.f32.mrf.mxu0 }
 0x69c   :  { %v2577_v50 = vsel %vm3385_vm4, %v3651_v49, 0.0 }
 0x69d   :  { %v2492_v18 = vpop.f32.mrf.mxu0 }
 0x69e   :  { %v2575_v44 = vsel %vm3385_vm4, %v2492_v18, 0.0 }
 0x69f   :  { %v3652_v30 = vpop.f32.mrf.mxu0  ;;  %v2581_v51 = vadd.f32 %v2575_v44, %v2560_v8 }
 0x6a0   :  { %v2578_v53 = vsel %vm3385_vm4, %v3652_v30, 0.0 }
 0x6a1   :  { %v2495_v13 = vpop.f32.mrf.mxu0  ;;  %v2584_v32 = vadd.f32 %v2578_v53, %v2563_v6 }
 0x6a2   :  { %v2576_v5 = vsel %vm3385_vm4, %v2495_v13, 0.0  ;;  %v2583_v13 = vadd.f32 %v2577_v50, %v2562_v16  ;;  %v3821_v50 = vld [vmem:[%s4966_s1 + $0x194] sm:$0xff]   ;;  %v3822_v16 = vld [vmem:[%s4966_s1 + $0x18c] sm:$0xff]   ;;  %vm3195_vm4 = vcmask 9216  }
 0x6a3   :  { %v3655_v28 = vpop.f32.mrf.mxu0  ;;  %v2582_v34 = vadd.f32 %v2576_v5, %v2561_v57 }
 0x6a4   :  { %v2590_v35 = vsel %vm3391_vm8, %v3655_v28, 0.0 }
 0x6a5   :  { %v2508_v14 = vpop.f32.mrf.mxu0  ;;  %v2596_v19 = vadd.f32 %v2590_v35, %v2581_v51 }
 0x6a6   :  { %v2588_v20 = vsel %vm3391_vm8, %v2508_v14, 0.0 }
 0x6a7   :  { %v3656_v15 = vpop.f32.mrf.mxu0  ;;  %v2594_v62 = vadd.f32 %v2588_v20, %v2579_v24 }
 0x6a8   :  { %v2591_v56 = vsel %vm3391_vm8, %v3656_v15, 0.0 }
 0x6a9   :  { %v2511_v33 = vpop.f32.mrf.mxu0  ;;  %v2597_v55 = vadd.f32 %v2591_v56, %v2582_v34 }
 0x6aa   :  { %v2589_v36 = vsel %vm3391_vm8, %v2511_v33, 0.0 }
 0x6ab   :  { %v3659_v4 = vpop.f32.mrf.mxu0  ;;  %v2595_v58 = vadd.f32 %v2589_v36, %v2580_v21 }
 0x6ac   :  { %v2603_v10 = vsel %vm3397_vm5, %v3659_v4, 0.0 }
 0x6ad   :  { %v2524_v25 = vpop.f32.mrf.mxu0  ;;  %v2609_v27 = vadd.f32 %v2603_v10, %v2594_v62 }
 0x6ae   :  { %v2592_v18 = vsel %vm3391_vm8, %v2524_v25, 0.0 }
 0x6af   :  { %v3660_v42 = vpop.f32.mrf.mxu0  ;;  %v2598_v49 = vadd.f32 %v2592_v18, %v2583_v13 }
 0x6b0   :  { %v2604_v31 = vsel %vm3397_vm5, %v3660_v42, 0.0 }
 0x6b1   :  { %v2610_v9 = vadd.f32 %v2604_v31, %v2595_v58  ;;  %v2527_v40 = vpop.f32.mrf.mxu0 }
 0x6b2   :  { %v2593_v12 = vsel %vm3391_vm8, %v2527_v40, 0.0 }
 0x6b3   :  { %v2619_v37 = vpack.c.bf16 %v2610_v9, %v2609_v27  ;;  %v2599_v28 = vadd.f32 %v2593_v12, %v2584_v32 }
 0x6b5   :  { %3670 = vmatmul.mubr.msk.bf16.vlgmr.msra.gmra.mxu1 %vm1620_vm2, %v2619_v37 }
 0x6b6   :  { %3673 = vmatprep.mubr.msk.bf16.mxu1 %vm3985_vm3, %v3984_v39  ;;  %3682 = vmatpush3.bf16.msra.mxu1 %v3821_v50 }
 0x6b7   :  { %3683 = vmatprep.subr.bf16.mxu1 %v3984_v39 }
 0x6ba   :  { %3684 = vmatpush3.bf16.msra.mxu1 %v3822_v16 }
 0x6bb   :  { %3717 = vmatprep.subr.bf16.mxu1 %v3984_v39 }
 0x6cb   :  { %v3663_v43 = vpop.f32.mrf.mxu0 }
 0x6cc   :  { %v2607_v23 = vsel %vm3397_vm5, %v3663_v43, 0.0 }
 0x6cd   :  { %v2540_v17 = vpop.f32.mrf.mxu0  ;;  %v2613_v15 = vadd.f32 %v2607_v23, %v2598_v49 }
 0x6ce   :  { %v2605_v7 = vsel %vm3397_vm5, %v2540_v17, 0.0 }
 0x6cf   :  { %v3664_v26 = vpop.f32.mrf.mxu0  ;;  %v2611_v22 = vadd.f32 %v2605_v7, %v2596_v19 }
 0x6d0   :  { %v2608_v30 = vsel %vm3397_vm5, %v3664_v26, 0.0 }
 0x6d1   :  { %v2543_v0 = vpop.f32.mrf.mxu0  ;;  %v2614_v14 = vadd.f32 %v2608_v30, %v2599_v28 }
 0x6d2   :  { %v2606_v1 = vsel %vm3397_vm5, %v2543_v0, 0.0 }
 0x6d3   :  { %v2612_v41 = vadd.f32 %v2606_v1, %v2597_v55  ;;  %v2621_v3 = vpack.c.bf16 %v2614_v14, %v2613_v15 }
 0x6d5   :  { %v2620_v48 = vpack.c.bf16 %v2612_v41, %v2611_v22 }
 0x6d7   :  { %3674 = vmatmul.mubr.msk.bf16.gmra.mxu1 %vm1620_vm2, %v2620_v48 }
 0x6d8   :  { %3677 = vmatprep.mubr.msk.bf16.mxu1 %vm3985_vm3, %v3984_v39 }
 0x6df   :  { %3678 = vmatmul.mubr.msk.bf16.gmra.mxu1 %vm1620_vm2, %v2621_v3 }
 0x6e0   :  { %3685 = vmatprep.mubr.msk.bf16.mxu1 %vm3985_vm3, %v3984_v39 }
 0x775   :  { %v2677_v33 = vpop.f32.mrf.mxu1 }
 0x776   :  { %v2700_v52 = vadd.f32 %v2677_v33, %v4218_v29 }
 0x777   :  { %v3671_v59 = vpop.f32.mrf.mxu1 }
 0x778   :  { %v4834_v4 = vadd.f32 %v3440_v47, %v2700_v52 }
 0x779   :  { %v2680_v60 = vpop.f32.mrf.mxu1 }
 0x77a   :  { %v2701_v11 = vadd.f32 %v2680_v60, %v4222_v38  ;;  %v2719_v20 = vsel %vm1620_vm2, %v4834_v4, 0.0 }
 0x77b   :  { %2720 = vadd.xlane.f32.xlu0 %v2719_v20  ;;  %v3672_v36 = vpop.f32.mrf.mxu1 }
 0x77c   :  { %v4839_v24 = vadd.f32 %v3440_v47, %v2701_v11 }
 0x77e   :  { %v2722_v21 = vsel %vm1620_vm2, %v4839_v24, 0.0 }
 0x77f   :  { %2723 = vadd.xlane.f32.xlu0 %v2722_v21 }
 0x797   :  { %v2685_v25 = vpop.f32.mrf.mxu1 }
 0x798   :  { %v2702_v29 = vadd.f32 %v2685_v25, %v4226_v46 }
 0x799   :  { %v3675_v10 = vpop.f32.mrf.mxu1 }
 0x79a   :  { %v4844_v62 = vadd.f32 %v3440_v47, %v2702_v29  ;;  %v3441_v29 = vld [vmem:[%s4967_s2 + $0x4] ss:$0 sm:$0xff] }
 0x79b   :  { %v2688_v58 = vpop.f32.mrf.mxu1 }
 0x79c   :  { %v2703_v38 = vadd.f32 %v2688_v58, %v4230_v54  ;;  %v2725_v42 = vsel %vm1620_vm2, %v4844_v62, 0.0 }
 0x79d   :  { %2726 = vadd.xlane.f32.xlu0 %v2725_v42  ;;  %v3676_v31 = vpop.f32.mrf.mxu1  ;;  %v3442_v42 = vld [vmem:[%s4967_s2 + $0x5] ss:$0 sm:$0xff] }
 0x79e   :  { %v4849_v27 = vadd.f32 %v3440_v47, %v2703_v38 }
 0x79f   :  { %v2693_v9 = vpop.f32.mrf.mxu1 }
 0x7a0   :  { %v2704_v37 = vadd.f32 %v2693_v9, %v4234_v61  ;;  %v2728_v40 = vsel %vm1620_vm2, %v4849_v27, 0.0 }
 0x7a1   :  { %2729 = vadd.xlane.f32.xlu0 %v2728_v40  ;;  %v3679_v46 = vpop.f32.mrf.mxu1 }
 0x7a2   :  { %v4854_v43 = vadd.f32 %v3440_v47, %v2704_v37 }
 0x7a3   :  { %v2696_v44 = vpop.f32.mrf.mxu1 }
 0x7a4   :  { %v2705_v54 = vadd.f32 %v2696_v44, %v4238_v2  ;;  %v2731_v5 = vsel %vm1620_vm2, %v4854_v43, 0.0 }
 0x7a5   :  { %2732 = vadd.xlane.f32.xlu0 %v2731_v5  ;;  %v3680_v17 = vpop.f32.mrf.mxu1 }
 0x7a6   :  { %v4859_v8 = vadd.f32 %v3440_v47, %v2705_v54 }
 0x7a8   :  { %v2734_v61 = vsel %vm1620_vm2, %v4859_v8, 0.0 }
 0x7a9   :  { %2735 = vadd.xlane.f32.xlu0 %v2734_v61 }
 0x804   :  { %v2721_v57 = vpop.xlane.xlu0 %2720 }
 0x805   :  { %v2737_v35 = vmul.f32 0.03125, %v2721_v57 }
 0x807   :  { %v2743_v56 = vsub.f32 %v4834_v4, %v2737_v35 }
 0x808   :  { %v2724_v51 = vpop.xlane.xlu0 %2723 }
 0x809   :  { %v2738_v34 = vmul.f32 0.03125, %v2724_v51  ;;  %v2749_v26 = vmul.f32 %v2743_v56, %v2743_v56 }
 0x80b   :  { %v2744_v2 = vsub.f32 %v4839_v24, %v2738_v34  ;;  %v2755_v7 = vsel %vm1620_vm2, %v2749_v26, 0.0 }
 0x80c   :  { %2756 = vadd.xlane.f32.xlu1 %v2755_v7 }
 0x80d   :  { %v2750_v19 = vmul.f32 %v2744_v2, %v2744_v2 }
 0x80f   :  { %v2758_v55 = vsel %vm1620_vm2, %v2750_v19, 0.0 }
 0x810   :  { %2759 = vadd.xlane.f32.xlu0 %v2758_v55 }
 0x826   :  { %v2727_v0 = vpop.xlane.xlu0 %2726 }
 0x827   :  { %v2739_v53 = vmul.f32 0.03125, %v2727_v0 }
 0x829   :  { %v4868_v1 = vsub.f32 %v4844_v62, %v2739_v53 }
 0x82a   :  { %v2730_v22 = vpop.xlane.xlu0 %2729 }
 0x82b   :  { %v2740_v41 = vmul.f32 0.03125, %v2730_v22  ;;  %v2751_v6 = vmul.f32 %v4868_v1, %v4868_v1 }
 0x82d   :  { %v4876_v12 = vsub.f32 %v4849_v27, %v2740_v41  ;;  %v2761_v32 = vsel %vm1620_vm2, %v2751_v6, 0.0 }
 0x82e   :  { %2762 = vadd.xlane.f32.xlu1 %v2761_v32  ;;  %v2733_v48 = vpop.xlane.xlu0 %2732 }
 0x82f   :  { %v2741_v18 = vmul.f32 0.03125, %v2733_v48  ;;  %v2752_v30 = vmul.f32 %v4876_v12, %v4876_v12 }
 0x831   :  { %v2747_v13 = vsub.f32 %v4854_v43, %v2741_v18  ;;  %v2764_v28 = vsel %vm1620_vm2, %v2752_v30, 0.0 }
 0x832   :  { %2765 = vadd.xlane.f32.xlu0 %v2764_v28  ;;  %v2736_v23 = vpop.xlane.xlu0 %2735 }
 0x833   :  { %v2742_v49 = vmul.f32 0.03125, %v2736_v23  ;;  %v2753_v14 = vmul.f32 %v2747_v13, %v2747_v13 }
 0x835   :  { %v2748_v15 = vsub.f32 %v4859_v8, %v2742_v49  ;;  %v2767_v3 = vsel %vm1620_vm2, %v2753_v14, 0.0  ;;  %v3825_v49 = vld [vmem:[%s4966_s1 + $0x1a4] sm:$0xff]   ;;  %v3826_v14 = vld [vmem:[%s4966_s1 + $0x19c] sm:$0xff]  }
 0x836   :  { %2768 = vadd.xlane.f32.xlu1 %v2767_v3 }
 0x837   :  { %v2754_v33 = vmul.f32 %v2748_v15, %v2748_v15 }
 0x839   :  { %v2770_v47 = vsel %vm1620_vm2, %v2754_v33, 0.0 }
 0x83a   :  { %2771 = vadd.xlane.f32.xlu0 %v2770_v47 }
 0x895   :  { %v2757_v52 = vpop.xlane.xlu1 %2756 }
 0x896   :  { %v2773_v59 = vmul.f32 0.03125, %v2757_v52 }
 0x898   :  { %v2779_v60 = vadd.f32 1e-05, %v2773_v59 }
 0x899   :  { %v2760_v11 = vpop.xlane.xlu0 %2759 }
 0x89a   :  { %3937 = vrsqrt.f32 %v2779_v60  ;;  %v2774_v20 = vmul.f32 0.03125, %v2760_v11 }
 0x89c   :  { %v2780_v36 = vadd.f32 1e-05, %v2774_v20 }
 0x89e   :  { %3939 = vrsqrt.f32 %v2780_v36 }
 0x8a7   :  { %v3938_v21 = vpop.eup %3937 }
 0x8a8   :  { %v2791_v25 = vmul.f32 %v3938_v21, %v2743_v56 }
 0x8aa   :  { %v2801_v58 = vmul.f32 %v3441_v29, %v2791_v25 }
 0x8ab   :  { %v3940_v10 = vpop.eup %3939 }
 0x8ac   :  { %v2792_v38 = vmul.f32 %v3940_v10, %v2744_v2  ;;  %v2811_v9 = vadd.f32 %v3442_v42, %v2801_v58 }
 0x8ae   :  { %v2802_v31 = vmul.f32 %v3441_v29, %v2792_v38 }
 0x8b0   :  { %v2812_v37 = vadd.f32 %v3442_v42, %v2802_v31 }
 0x8b2   :  { %v2821_v40 = vpack.c.bf16 %v2812_v37, %v2811_v9 }
 0x8b4   :  { %3686 = vmatmul.mubr.msk.bf16.vlgmr.msra.gmra.mxu1 %vm1620_vm2, %v2821_v40 }
 0x8b5   :  { %3689 = vmatprep.mubr.msk.bf16.mxu1 %vm3985_vm3, %v3984_v39 }
 0x8b7   :  { %v2763_v46 = vpop.xlane.xlu1 %2762 }
 0x8b8   :  { %v2775_v44 = vmul.f32 0.03125, %v2763_v46 }
 0x8ba   :  { %v2781_v54 = vadd.f32 1e-05, %v2775_v44 }
 0x8bb   :  { %v2766_v5 = vpop.xlane.xlu0 %2765 }
 0x8bc   :  { %3941 = vrsqrt.f32 %v2781_v54  ;;  %v2776_v17 = vmul.f32 0.03125, %v2766_v5 }
 0x8be   :  { %v2782_v61 = vadd.f32 1e-05, %v2776_v17 }
 0x8bf   :  { %v2769_v57 = vpop.xlane.xlu1 %2768 }
 0x8c0   :  { %3943 = vrsqrt.f32 %v2782_v61  ;;  %v2777_v35 = vmul.f32 0.03125, %v2769_v57 }
 0x8c2   :  { %v2783_v56 = vadd.f32 1e-05, %v2777_v35 }
 0x8c3   :  { %v2772_v51 = vpop.xlane.xlu0 %2771 }
 0x8c4   :  { %3945 = vrsqrt.f32 %v2783_v56  ;;  %v2778_v34 = vmul.f32 0.03125, %v2772_v51 }
 0x8c6   :  { %v2784_v26 = vadd.f32 1e-05, %v2778_v34 }
 0x8c8   :  { %3947 = vrsqrt.f32 %v2784_v26 }
 0x8c9   :  { %v3942_v2 = vpop.eup %3941 }
 0x8ca   :  { %v2793_v7 = vmul.f32 %v3942_v2, %v4868_v1 }
 0x8cc   :  { %v2803_v0 = vmul.f32 %v3441_v29, %v2793_v7 }
 0x8cd   :  { %v3944_v19 = vpop.eup %3943 }
 0x8ce   :  { %v2794_v55 = vmul.f32 %v3944_v19, %v4876_v12  ;;  %v2813_v41 = vadd.f32 %v3442_v42, %v2803_v0  ;;  %v3823_v12 = vld [vmem:[%s4966_s1 + $0x1b4] sm:$0xff]  }
 0x8cf   :  { %3698 = vmatpush3.bf16.msra.mxu0 %v3823_v12 }
 0x8d0   :  { %v2804_v53 = vmul.f32 %v3441_v29, %v2794_v55  ;;  %3699 = vmatprep.subr.bf16.mxu0 %v3984_v39 }
 0x8d1   :  { %v3946_v22 = vpop.eup %3945 }
 0x8d2   :  { %v2814_v6 = vadd.f32 %v3442_v42, %v2804_v53  ;;  %v2795_v50 = vmul.f32 %v3946_v22, %v2747_v13  ;;  %v3824_v13 = vld [vmem:[%s4966_s1 + $0x1ac] sm:$0xff]  }
 0x8d3   :  { %3700 = vmatpush3.bf16.msra.mxu0 %v3824_v13 }
 0x8d4   :  { %v2822_v32 = vpack.c.bf16 %v2814_v6, %v2813_v41  ;;  %v2805_v18 = vmul.f32 %v3441_v29, %v2795_v50  ;;  %3701 = vmatprep.subr.bf16.mxu0 %v3984_v39 }
 0x8d5   :  { %v3948_v48 = vpop.eup %3947 }
 0x8d6   :  { %3690 = vmatmul.mubr.msk.bf16.gmra.mxu1 %vm1620_vm2, %v2822_v32  ;;  %v2796_v16 = vmul.f32 %v3948_v48, %v2748_v15  ;;  %v2815_v1 = vadd.f32 %v3442_v42, %v2805_v18  ;;  %v3443_v15 = vld [vmem:[%s4967_s2 + $0x6] ss:$0 sm:$0xff] }
 0x8d7   :  { %3693 = vmatprep.mubr.msk.bf16.mxu1 %vm3985_vm3, %v3984_v39  ;;  %3702 = vmatpush3.bf16.msra.mxu0 %v3825_v49 }
 0x8d8   :  { %v2806_v30 = vmul.f32 %v3441_v29, %v2796_v16  ;;  %3703 = vmatprep.subr.bf16.mxu0 %v3984_v39 }
 0x8da   :  { %v2816_v28 = vadd.f32 %v3442_v42, %v2806_v30 }
 0x8db   :  { %3704 = vmatpush3.bf16.msra.mxu0 %v3826_v14 }
 0x8dc   :  { %v2823_v23 = vpack.c.bf16 %v2816_v28, %v2815_v1  ;;  %3727 = vmatprep.subr.bf16.mxu0 %v3984_v39 }
 0x8de   :  { %3694 = vmatmul.mubr.msk.bf16.gmra.mxu1 %vm1620_vm2, %v2823_v23 }
 0x8df   :  { %3723 = vmatprep.mubr.msk.bf16.mxu1 %vm3985_vm3, %v3984_v39 }
 0x974   :  { %v2884_v3 = vpop.f32.mrf.mxu1 }
 0x975   :  { %v2885_v33 = vadd.f32 %v3443_v15, %v2884_v3 }
 0x976   :  { %v3687_v47 = vpop.f32.mrf.mxu1 }
 0x977   :  { %v2907_v52 = vmul.f32 %v2885_v33, %v2885_v33 }
 0x978   :  { %v2887_v59 = vpop.f32.mrf.mxu1 }
 0x979   :  { %v2913_v60 = vmul.f32 %v2907_v52, %v2885_v33  ;;  %v2888_v11 = vadd.f32 %v3443_v15, %v2887_v59 }
 0x97a   :  { %v3688_v20 = vpop.f32.mrf.mxu1 }
 0x97b   :  { %v2919_v36 = vmul.f32 0.044715, %v2913_v60  ;;  %v2908_v21 = vmul.f32 %v2888_v11, %v2888_v11 }
 0x97d   :  { %v2925_v25 = vadd.f32 %v2919_v36, %v2885_v33  ;;  %v2914_v29 = vmul.f32 %v2908_v21, %v2888_v11 }
 0x97f   :  { %v2931_v10 = vmul.f32 0.7978846, %v2925_v25  ;;  %v2920_v58 = vmul.f32 0.044715, %v2914_v29 }
 0x981   :  { %3949 = vtanh.f32 %v2931_v10  ;;  %v2926_v38 = vadd.f32 %v2920_v58, %v2888_v11 }
 0x983   :  { %v2932_v42 = vmul.f32 0.7978846, %v2926_v38 }
 0x985   :  { %3951 = vtanh.f32 %v2932_v42 }
 0x98e   :  { %v3950_v31 = vpop.eup %3949 }
 0x98f   :  { %v2943_v9 = vadd.f32 1.0, %v3950_v31 }
 0x991   :  { %v2949_v40 = vmul.f32 0.5, %v2943_v9 }
 0x992   :  { %v3952_v37 = vpop.eup %3951 }
 0x993   :  { %v2944_v46 = vadd.f32 1.0, %v3952_v37  ;;  %v2955_v5 = vmul.f32 %v2949_v40, %v2885_v33 }
 0x995   :  { %v2950_v44 = vmul.f32 0.5, %v2944_v46  ;;  %v3827_v46 = vld [vmem:[%s4966_s1 + $0x1c4] sm:$0xff]  }
 0x996   :  { %v2892_v54 = vpop.f32.mrf.mxu1 }
 0x997   :  { %v2956_v17 = vmul.f32 %v2950_v44, %v2888_v11  ;;  %v2893_v61 = vadd.f32 %v3443_v15, %v2892_v54  ;;  %v3828_v44 = vld [vmem:[%s4966_s1 + $0x1bc] sm:$0xff]  }
 0x998   :  { %v3691_v57 = vpop.f32.mrf.mxu1 }
 0x999   :  { %v2969_v35 = vpack.c.bf16 %v2956_v17, %v2955_v5  ;;  %v2909_v56 = vmul.f32 %v2893_v61, %v2893_v61 }
 0x99a   :  { %v2895_v51 = vpop.f32.mrf.mxu1 }
 0x99b   :  { %v2915_v34 = vmul.f32 %v2909_v56, %v2893_v61  ;;  %v2896_v26 = vadd.f32 %v3443_v15, %v2895_v51  ;;  %3706 = vmatmul.mubr.msk.bf16.vlgmr.msra.gmra.mxu0 %vm2996_vm7, %v2969_v35 }
 0x99c   :  { %v3692_v2 = vpop.f32.mrf.mxu1  ;;  %3709 = vmatprep.mubr.msk.bf16.mxu0 %vm3985_vm3, %v3984_v39  ;;  %3728 = vmatpush3.bf16.msra.mxu0 %v3827_v46 }
 0x99d   :  { %v2921_v7 = vmul.f32 0.044715, %v2915_v34  ;;  %v2910_v19 = vmul.f32 %v2896_v26, %v2896_v26  ;;  %3729 = vmatprep.subr.bf16.mxu0 %v3984_v39 }
 0x99e   :  { %v2900_v55 = vpop.f32.mrf.mxu1 }
 0x99f   :  { %v2927_v0 = vadd.f32 %v2921_v7, %v2893_v61  ;;  %v2916_v53 = vmul.f32 %v2910_v19, %v2896_v26  ;;  %v2901_v22 = vadd.f32 %v3443_v15, %v2900_v55 }
 0x9a0   :  { %v3695_v41 = vpop.f32.mrf.mxu1  ;;  %3730 = vmatpush3.bf16.msra.mxu0 %v3828_v44 }
 0x9a1   :  { %v2933_v6 = vmul.f32 0.7978846, %v2927_v0  ;;  %v2922_v50 = vmul.f32 0.044715, %v2916_v53  ;;  %v2911_v32 = vmul.f32 %v2901_v22, %v2901_v22  ;;  %v3456_v0 = vld [vmem:[%s4967_s2 + $0x7] ss:$0 sm:$0xff] }
 0x9a2   :  { %v2903_v48 = vpop.f32.mrf.mxu1 }
 0x9a3   :  { %3953 = vtanh.f32 %v2933_v6  ;;  %v2928_v16 = vadd.f32 %v2922_v50, %v2896_v26  ;;  %v2917_v18 = vmul.f32 %v2911_v32, %v2901_v22  ;;  %v2904_v30 = vadd.f32 %v3443_v15, %v2903_v48 }
 0x9a4   :  { %v3696_v1 = vpop.f32.mrf.mxu1 }
 0x9a5   :  { %v2934_v28 = vmul.f32 0.7978846, %v2928_v16  ;;  %v2923_v23 = vmul.f32 0.044715, %v2917_v18  ;;  %v2912_v12 = vmul.f32 %v2904_v30, %v2904_v30 }
 0x9a7   :  { %3955 = vtanh.f32 %v2934_v28  ;;  %v2929_v13 = vadd.f32 %v2923_v23, %v2901_v22  ;;  %v2918_v49 = vmul.f32 %v2912_v12, %v2904_v30 }
 0x9a9   :  { %v2935_v14 = vmul.f32 0.7978846, %v2929_v13  ;;  %v2924_v3 = vmul.f32 0.044715, %v2918_v49 }
 0x9ab   :  { %3957 = vtanh.f32 %v2935_v14  ;;  %v2930_v33 = vadd.f32 %v2924_v3, %v2904_v30 }
 0x9ad   :  { %v2936_v47 = vmul.f32 0.7978846, %v2930_v33 }
 0x9af   :  { %3959 = vtanh.f32 %v2936_v47 }
 0x9b0   :  { %v3954_v52 = vpop.eup %3953 }
 0x9b1   :  { %v2945_v59 = vadd.f32 1.0, %v3954_v52 }
 0x9b3   :  { %v2951_v11 = vmul.f32 0.5, %v2945_v59 }
 0x9b4   :  { %v3956_v60 = vpop.eup %3955 }
 0x9b5   :  { %v2946_v20 = vadd.f32 1.0, %v3956_v60  ;;  %v2957_v21 = vmul.f32 %v2951_v11, %v2893_v61 }
 0x9b7   :  { %v2952_v36 = vmul.f32 0.5, %v2946_v20 }
 0x9b8   :  { %v3958_v15 = vpop.eup %3957 }
 0x9b9   :  { %v2958_v25 = vmul.f32 %v2952_v36, %v2896_v26  ;;  %v2947_v29 = vadd.f32 1.0, %v3958_v15 }
 0x9bb   :  { %v2970_v10 = vpack.c.bf16 %v2958_v25, %v2957_v21  ;;  %v2953_v38 = vmul.f32 0.5, %v2947_v29 }
 0x9bc   :  { %v3960_v58 = vpop.eup %3959 }
 0x9bd   :  { %v2948_v42 = vadd.f32 1.0, %v3960_v58  ;;  %3710 = vmatmul.mubr.msk.bf16.gmra.mxu0 %vm2996_vm7, %v2970_v10  ;;  %v2959_v9 = vmul.f32 %v2953_v38, %v2901_v22 }
 0x9be   :  { %3713 = vmatprep.mubr.msk.bf16.mxu0 %vm3985_vm3, %v3984_v39 }
 0x9bf   :  { %v2954_v31 = vmul.f32 0.5, %v2948_v42 }
 0x9c1   :  { %v2960_v37 = vmul.f32 %v2954_v31, %v2904_v30 }
 0x9c3   :  { %v2971_v40 = vpack.c.bf16 %v2960_v37, %v2959_v9 }
 0x9c5   :  { %3714 = vmatmul.mubr.msk.bf16.gmra.mxu0 %vm2996_vm7, %v2971_v40 }
 0x9c6   :  { %3731 = vmatprep.mubr.msk.bf16.mxu0 %vm3985_vm3, %v3984_v39  ;;  %vm3080_vm3 = vcmp.eq.s32.totalorder %v4434_v63, %v4315_v45  ;;  %v3461_v63 = vld [vmem:[%s4967_s2 + $0x8] ss:$0 sm:$0xff] }
 0xa5b   :  { %v3040_v54 = vpop.f32.mrf.mxu0 }
 0xa5d   :  { %v3707_v5 = vpop.f32.mrf.mxu0 }
 0xa5f   :  { %v3043_v17 = vpop.f32.mrf.mxu0 }
 0xa60   :  { %v3064_v50 = vadd.f32 %v3043_v17, %v4839_v24 }
 0xa61   :  { %v3708_v61 = vpop.f32.mrf.mxu0 }
 0xa7d   :  { %v3048_v57 = vpop.f32.mrf.mxu0 }
 0xa7e   :  { %v3065_v22 = vadd.f32 %v3048_v57, %v4844_v62  ;;  %v3081_v62 = vsel %vm3080_vm3, 1.0, %v3984_v39 }
 0xa7f   :  { %v3711_v35 = vpop.f32.mrf.mxu0  ;;  %v3082_v30 = vpack.c.bf16 %v3081_v62, %v3081_v62 }
 0xa80   :  { %v3076_v16 = vadd.f32 %v3456_v0, %v3065_v22 }
 0xa81   :  { %v3051_v56 = vpop.f32.mrf.mxu0 }
 0xa82   :  { %v3066_v19 = vadd.f32 %v3051_v56, %v4849_v27  ;;  %v3075_v27 = vadd.f32 %v3456_v0, %v3064_v50 }
 0xa83   :  { %v3712_v51 = vpop.f32.mrf.mxu0 }
 0xa84   :  { %v3077_v32 = vadd.f32 %v3456_v0, %v3066_v19 }
 0xa85   :  { %v3056_v34 = vpop.f32.mrf.mxu0 }
 0xa86   :  { %v3067_v2 = vadd.f32 %v3056_v34, %v4854_v43  ;;  %v3063_v43 = vadd.f32 %v3040_v54, %v4834_v4 }
 0xa87   :  { %v3715_v26 = vpop.f32.mrf.mxu0 }
 0xa88   :  { %v3078_v41 = vadd.f32 %v3456_v0, %v3067_v2  ;;  %v3074_v18 = vadd.f32 %v3456_v0, %v3063_v43 }
 0xa89   :  { %v3059_v7 = vpop.f32.mrf.mxu0 }
 0xa8a   :  { %v3068_v55 = vadd.f32 %v3059_v7, %v4859_v8  ;;  %v3084_v8 = vpack.c.bf16 %v3077_v32, %v3076_v16  ;;  %v3083_v24 = vpack.c.bf16 %v3075_v27, %v3074_v18 }
 0xa8b   :  { %v3716_v53 = vpop.f32.mrf.mxu0 }
 0xa8c   :  { %v3079_v6 = vadd.f32 %v3456_v0, %v3068_v55 }
 0xa8e   :  { %v3085_v48 = vpack.c.bf16 %v3079_v6, %v3078_v41 }
 0xa90   :  { %3718 = vmatpush3.bf16.msra.mxu1 %v3085_v48 }
 0xa91   :  { %3719 = vmatprep.subr.bf16.mxu1 %v3984_v39 }
 0xa94   :  { %3720 = vmatpush3.bf16.msra.mxu1 %v3084_v8 }
 0xa95   :  { %3721 = vmatprep.subr.bf16.mxu1 %v3984_v39 }
 0xa98   :  { %3722 = vmatpush3.bf16.msra.mxu1 %v3083_v24 }
 0xa9b   :  { %3724 = vmatmul.mubr.msk.bf16.vlgmr.msra.gmra.mxu1 %vm2104_vm14, %v3082_v30 }
 0xb5b   :  { %v3123_v4 = vpop.f32.mrf.mxu1 }
 0xb5c   :  { %v3133_v1 = vpack.c.bf16 %v3123_v4, %v3123_v4 }
 0xb5d   :  { %v3725_v28 = vpop.f32.mrf.mxu1 }
 0xb5e   :  { %3732 = vmatmul.mubr.msk.bf16.vlgmr.msra.gmra.mxu0 %vm1620_vm2, %v3133_v1 }
 0xb5f   :  { %v3126_v23 = vpop.f32.mrf.mxu1 }
 0xb61   :  { %v3726_v45 = vpop.f32.mrf.mxu1 }
 0xc1e   :  { %v3183_v12 = vpop.f32.mrf.mxu0 }
 0xc1f   :  { %v3194_v39 = vadd.f32 %v3461_v63, %v3183_v12 }
 0xc20   :  { %v3733_v13 = vpop.f32.mrf.mxu0 }
 0xc21   :  { %3196 = vst.msk [vmem:[#allocation2] sm:$0x3] %vm3195_vm4, %v3194_v39 }
 0xc22   :  { %v3186_v49 = vpop.f32.mrf.mxu0 }
 0xc23   :  { %3972 = shalt.err (!%p3969_p4)
}
 0xc24   :  { %3206 = dma.vmem_to_hbm [thread:$0]  %s3204_s20, 32, %s4968_s3, [#allocation3]   ;;  %v3734_v14 = vpop.f32.mrf.mxu0 }
 0xc25   :  { %3981 = dma.done.wait [#allocation3], 32  }
 0xc26   :  { %3982 = vsyncadd [#allocation3], 4294967264 }
 0xc27   :  { %3210 = vsyncpa [#allocation3], 1 }

</bundles_post_ra>
